<compile_context>
chip_gen: v5e
topology: v5e:2x2
jax: 0.10.0
libtpu: 0.0.40
codegen_flags: <defaults>
</compile_context>

<pallas_src>
import math

import jax
import jax.numpy as jnp
from jax.experimental import pallas as pl
from jax.experimental.pallas import tpu as pltpu

LANE = 128                      # lane-pad output channel dims -> unmasked vst
MAX_TILE_M = 2048               # row-tile cap for the conv grids (multiple of 16)
MAX_TILE_B = 1024               # row-tile cap for the fc grid (rows are 3200 lanes wide)
VMEM_LIMIT = 32 * 1024 * 1024   # explicit scoped-VMEM budget; safe on v5e/v6e/v7x


def _round_up(x, m):
    return (x + m - 1) // m * m


def _pick_tile(m, max_tile):
    """Row tile: multiple of 16 (bf16 sublane packing), >= 2 grid steps when possible
    (v7x has 2 TensorCores and 'parallel' only shards grids with >= 2 steps), capped so
    double-buffered blocks fit comfortably under the 32 MiB scoped-VMEM budget."""
    if m <= 16:
        return m                           # full extent for tiny row counts
    t = _round_up(-(-m // 2), 16)          # >= ceil(m/2), multiple of 16, always <= m
    return min(t, max_tile)


# ----------------------------- Pallas kernels ------------------------------

def _conv_pool_kernel(p_ref, w_ref, b_ref, o_ref):
    """Fused im2col-conv + bias + ReLU + 2x2 max-pool for one row tile.

    p_ref : (4, tile_m, K)  bf16 patch matrices, one row-group per pool-window corner
    w_ref : (K, 128)        bf16 conv weight, Cout zero-padded to 128 lanes
    b_ref : (1, 128)        f32 bias (zero-padded)
    o_ref : (tile_m, 128)   bf16 pooled activation
    """
    tm = o_ref.shape[0]
    p = p_ref[...].reshape(4 * tm, p_ref.shape[-1])     # free leading-dim merge
    y = jnp.dot(p, w_ref[...], preferred_element_type=jnp.float32)   # (4*tm, 128)
    # 2x2 max-pool = 4-way max over the corner row-groups (static, tile-aligned slices)
    y = jnp.maximum(jnp.maximum(y[0 * tm:1 * tm], y[1 * tm:2 * tm]),
                    jnp.maximum(y[2 * tm:3 * tm], y[3 * tm:4 * tm]))
    # shared bias + monotonic ReLU commute with the 4-way max
    y = jnp.maximum(y + b_ref[...], 0.0)
    o_ref[...] = y.astype(o_ref.dtype)


def _fc_head_kernel(x_ref, w1_ref, b1_ref, w2_ref, b2_ref, w3_ref, b3_ref, o_ref):
    """fc1+ReLU -> fc2+ReLU -> fc3; all intermediates stay in VMEM/vregs (128-lane wide)."""
    h = jnp.dot(x_ref[...], w1_ref[...], preferred_element_type=jnp.float32) + b1_ref[...]
    h = jnp.maximum(h, 0.0).astype(w2_ref.dtype)
    h = jnp.dot(h, w2_ref[...], preferred_element_type=jnp.float32) + b2_ref[...]
    h = jnp.maximum(h, 0.0).astype(w3_ref.dtype)
    y = jnp.dot(h, w3_ref[...], preferred_element_type=jnp.float32) + b3_ref[...]
    o_ref[...] = y.astype(o_ref.dtype)


# ------------------------------ wrappers ------------------------------------

def _corner_patches(x_nhwc, cin, kh, kw):
    """Stacked im2col matrix (4, B*Hp*Wp, cin*kh*kw): one row-group per 2x2-pool corner.

    Column order is (cin, kh, kw) flattened, matching PyTorch's (Cout,Cin,kh,kw) weight
    flatten.  The channel slice `:cin` fuses the lane-padding drop into the gather, so
    the padded conv1 activation is never re-materialized narrow in HBM.
    """
    # TODO(synk): move this patch gather fully in-kernel (DMA raw NHWC tile + shifted
    # static slices) to kill the ~20x im2col HBM amplification for large batches.
    B, H, W, _ = x_nhwc.shape
    x = x_nhwc[..., :cin]
    Ho, Wo = H - kh + 1, W - kw + 1
    assert Ho % 2 == 0 and Wo % 2 == 0, "pre-pool spatial dims must be even"
    Hp, Wp = Ho // 2, Wo // 2
    corners = []
    for di in (0, 1):
        for dj in (0, 1):
            cols = [x[:, di + i: di + i + 2 * Hp: 2,
                         dj + j: dj + j + 2 * Wp: 2, :]
                    for i in range(kh) for j in range(kw)]
            pat = jnp.stack(cols, axis=-1)                       # (B,Hp,Wp,cin,kh*kw)
            corners.append(pat.reshape(B * Hp * Wp, cin * kh * kw))
    stacked = jnp.stack(corners, axis=0).astype(jnp.bfloat16)    # (4, M, K)
    return stacked, (B, Hp, Wp)


def conv_relu_pool(x_nhwc, w_pad, b_pad, cin, kh=5, kw=5):
    """Valid 5x5 conv (stride 1) + bias + ReLU + 2x2/2 max-pool, one pallas_call.

    Returns the lane-padded activation (B, Hp, Wp, 128) in bf16 (no narrow-lane slice).
    """
    corners, (B, Hp, Wp) = _corner_patches(x_nhwc, cin, kh, kw)
    _, M, K = corners.shape
    Np = w_pad.shape[1]
    tile_m = _pick_tile(M, MAX_TILE_M)
    out = pl.pallas_call(
        _conv_pool_kernel,
        out_shape=jax.ShapeDtypeStruct((M, Np), jnp.bfloat16),
        grid=(pl.cdiv(M, tile_m),),
        in_specs=[pl.BlockSpec((4, tile_m, K), lambda m: (0, m, 0)),  # all 4 corners, 1 stream
                  pl.BlockSpec((K, Np), lambda m: (0, 0)),            # weight: VMEM-resident
                  pl.BlockSpec((1, Np), lambda m: (0, 0))],           # bias:   VMEM-resident
        out_specs=pl.BlockSpec((tile_m, Np), lambda m: (m, 0)),
        compiler_params=pltpu.CompilerParams(
            dimension_semantics=("parallel",),
            vmem_limit_bytes=VMEM_LIMIT),
    )(corners, w_pad, b_pad)
    return out.reshape(B, Hp, Wp, Np)


def fc_head(x, pp):
    """Fused fc1+ReLU -> fc2+ReLU -> fc3.  x: (B, 5*5*128) bf16 -> (B, 10) f32."""
    B, K = x.shape
    Np = pp["fc3_w"].shape[1]
    tile_b = _pick_tile(B, MAX_TILE_B)
    const = lambda a: pl.BlockSpec(a.shape, lambda m: (0, 0))
    out = pl.pallas_call(
        _fc_head_kernel,
        out_shape=jax.ShapeDtypeStruct((B, Np), jnp.float32),
        grid=(pl.cdiv(B, tile_b),),
        in_specs=[pl.BlockSpec((tile_b, K), lambda m: (m, 0)),
                  const(pp["fc1_w"]), const(pp["fc1_b"]),
                  const(pp["fc2_w"]), const(pp["fc2_b"]),
                  const(pp["fc3_w"]), const(pp["fc3_b"])],
        out_specs=pl.BlockSpec((tile_b, Np), lambda m: (m, 0)),
        compiler_params=pltpu.CompilerParams(
            dimension_semantics=("parallel",),
            vmem_limit_bytes=VMEM_LIMIT),
    )(x, pp["fc1_w"], pp["fc1_b"], pp["fc2_w"], pp["fc2_b"],
      pp["fc3_w"], pp["fc3_b"])
    return out[:, :10]                                           # drop lane padding


# --------------------------- parameters / forward ---------------------------

def init_params(key):
    ks = jax.random.split(key, 5)

    def xavier_normal(k, shape):  # torch.nn.init.xavier_normal_ for conv (O,I,kh,kw)
        fan_in = shape[1] * shape[2] * shape[3]
        fan_out = shape[0] * shape[2] * shape[3]
        std = math.sqrt(2.0 / (fan_in + fan_out))
        return std * jax.random.normal(k, shape, jnp.float32)

    return {
        "conv1_w": xavier_normal(ks[0], (6, 3, 5, 5)),
        "conv1_b": jnp.zeros((6,), jnp.float32),
        "conv2_w": xavier_normal(ks[1], (16, 6, 5, 5)),
        "conv2_b": jnp.zeros((16,), jnp.float32),
        "fc1_w": 0.01 * jax.random.normal(ks[2], (120, 400), jnp.float32),
        "fc1_b": jnp.zeros((120,), jnp.float32),
        "fc2_w": 0.01 * jax.random.normal(ks[3], (84, 120), jnp.float32),
        "fc2_b": jnp.zeros((84,), jnp.float32),
        "fc3_w": 0.01 * jax.random.normal(ks[4], (10, 84), jnp.float32),
        "fc3_b": jnp.zeros((10,), jnp.float32),
    }


def prepare_params(p):
    """One-time repack: conv OIHW -> (K, 128) lane-padded bf16; FC weights transposed,
    lane-padded to 128-wide outputs, and fc1 permuted to consume the padded NHWC flatten."""
    def conv_pack(w_oihw, b):
        cout, cin, kh, kw = w_oihw.shape
        w2d = w_oihw.reshape(cout, cin * kh * kw).T              # (K, Cout), torch flatten order
        w_pad = jnp.zeros((cin * kh * kw, LANE), jnp.bfloat16).at[:, :cout].set(
            w2d.astype(jnp.bfloat16))
        b_pad = jnp.zeros((1, LANE), jnp.float32).at[:, :cout].set(b)
        return w_pad, b_pad

    c1w, c1b = conv_pack(p["conv1_w"], p["conv1_b"])
    c2w, c2b = conv_pack(p["conv2_w"], p["conv2_b"])

    # fc1: fold torch's NCHW view(-1, 16*5*5) permutation into the weight rows so fc1
    # consumes the lane-padded NHWC flatten (B, 5*5*128) directly (no activation transpose).
    w1 = p["fc1_w"].reshape(120, 16, 5, 5)                       # (out, c, h, w)
    w1 = jnp.transpose(w1, (2, 3, 1, 0))                         # (h, w, c, out)
    fc1_w = (jnp.zeros((5, 5, LANE, LANE), jnp.bfloat16)
             .at[:, :, :16, :120].set(w1.astype(jnp.bfloat16))
             .reshape(5 * 5 * LANE, LANE))
    fc1_b = jnp.zeros((1, LANE), jnp.float32).at[:, :120].set(p["fc1_b"])

    fc2_w = jnp.zeros((LANE, LANE), jnp.bfloat16).at[:120, :84].set(
        p["fc2_w"].T.astype(jnp.bfloat16))
    fc2_b = jnp.zeros((1, LANE), jnp.float32).at[:, :84].set(p["fc2_b"])
    fc3_w = jnp.zeros((LANE, LANE), jnp.bfloat16).at[:84, :10].set(
        p["fc3_w"].T.astype(jnp.bfloat16))
    fc3_b = jnp.zeros((1, LANE), jnp.float32).at[:, :10].set(p["fc3_b"])

    return {
        "conv1_w": c1w, "conv1_b": c1b,
        "conv2_w": c2w, "conv2_b": c2b,
        "fc1_w": fc1_w, "fc1_b": fc1_b,
        "fc2_w": fc2_w, "fc2_b": fc2_b,
        "fc3_w": fc3_w, "fc3_b": fc3_b,
    }


@jax.jit
def net_forward(pp, x_nchw):
    B, _, H, W = x_nchw.shape
    assert (H, W) == (32, 32), "Net's 16*5*5 flatten requires 32x32 inputs"
    x = jnp.transpose(x_nchw, (0, 2, 3, 1)).astype(jnp.bfloat16)        # NCHW -> NHWC, bf16
    x = conv_relu_pool(x, pp["conv1_w"], pp["conv1_b"], cin=3)          # (B, 14, 14, 128) padded
    x = conv_relu_pool(x, pp["conv2_w"], pp["conv2_b"], cin=6)          # (B, 5, 5, 128) padded
    x = x.reshape(B, 5 * 5 * LANE)                                      # contiguous flatten (h,w,c_pad)
    return fc_head(x, pp)                                               # (B, 10) f32


if __name__ == "__main__":
    key = jax.random.PRNGKey(0)
    pkey, xkey = jax.random.split(key)
    params = prepare_params(init_params(pkey))
    # Input spatial size must be 32x32 so the 16*5*5 flatten is consistent.
    x = jax.random.normal(xkey, (2, 3, 32, 32), jnp.float32)
    out = jax.block_until_ready(net_forward(params, x))
    assert out.shape == (2, 10), out.shape
    assert bool(jnp.all(jnp.isfinite(out)))
    print("KERNEL_OK")
</pallas_src>

<mosaic_0001>
module attributes {stable_mosaic.version = 11 : i64} {
  func.func @_conv_pool_kernel(%arg0: i32, %arg1: memref<4x208x75xbf16, #tpu.memory_space<vmem>>, %arg2: memref<75x128xbf16, #tpu.memory_space<vmem>>, %arg3: memref<1x128xf32, #tpu.memory_space<vmem>>, %arg4: memref<208x128xbf16, #tpu.memory_space<vmem>>) attributes {dimension_semantics = [#tpu.dimension_semantics<parallel>], iteration_bounds = array<i64: 2>, scalar_prefetch = 0 : i64, scratch_operands = 0 : i64, tpu.core_type = #tpu.core_type<tc>, window_params = [{transform_indices = @transform_0, window_bounds = array<i64: 4, 208, 75>}, {pipeline_mode = #tpu.pipeline_mode<synchronous>, transform_indices = @transform_1, window_bounds = array<i64: 75, 128>}, {pipeline_mode = #tpu.pipeline_mode<synchronous>, transform_indices = @transform_2, window_bounds = array<i64: 1, 128>}, {transform_indices = @transform_3, window_bounds = array<i64: 208, 128>}]} {
    %c0 = arith.constant 0 : index
    %c0_0 = arith.constant 0 : index
    %c0_1 = arith.constant 0 : index
    %0 = vector.load %arg1[%c0, %c0_0, %c0_1] : memref<4x208x75xbf16, #tpu.memory_space<vmem>>, vector<4x208x75xbf16>
    %1 = vector.shape_cast %0 : vector<4x208x75xbf16> to vector<832x75xbf16>
    %c0_2 = arith.constant 0 : index
    %c0_3 = arith.constant 0 : index
    %2 = vector.load %arg2[%c0_2, %c0_3] : memref<75x128xbf16, #tpu.memory_space<vmem>>, vector<75x128xbf16>
    %cst = arith.constant dense<0.000000e+00> : vector<832x128xf32>
    %3 = tpu.matmul %1, %2, %cst {dimension_numbers = #tpu.dot_dimension_numbers<[1], [0], [0], [1], [0, 0, 1, 1], [], []>} : vector<832x75xbf16>, vector<75x128xbf16>, vector<832x128xf32> -> vector<832x128xf32>
    %4 = vector.extract_strided_slice %3 {offsets = [0, 0], sizes = [208, 128], strides = [1, 1]} : vector<832x128xf32> to vector<208x128xf32>
    %5 = vector.extract_strided_slice %3 {offsets = [208, 0], sizes = [208, 128], strides = [1, 1]} : vector<832x128xf32> to vector<208x128xf32>
    %6 = arith.maximumf %4, %5 : vector<208x128xf32>
    %7 = vector.extract_strided_slice %3 {offsets = [416, 0], sizes = [208, 128], strides = [1, 1]} : vector<832x128xf32> to vector<208x128xf32>
    %8 = vector.extract_strided_slice %3 {offsets = [624, 0], sizes = [208, 128], strides = [1, 1]} : vector<832x128xf32> to vector<208x128xf32>
    %9 = arith.maximumf %7, %8 : vector<208x128xf32>
    %10 = arith.maximumf %6, %9 : vector<208x128xf32>
    %c0_4 = arith.constant 0 : index
    %c0_5 = arith.constant 0 : index
    %11 = vector.load %arg3[%c0_4, %c0_5] : memref<1x128xf32, #tpu.memory_space<vmem>>, vector<1x128xf32>
    %12 = vector.broadcast %11 : vector<1x128xf32> to vector<208x128xf32>
    %13 = arith.addf %10, %12 : vector<208x128xf32>
    %cst_6 = arith.constant 0.000000e+00 : f32
    %14 = vector.broadcast %cst_6 : f32 to vector<208x128xf32>
    %15 = arith.maximumf %13, %14 : vector<208x128xf32>
    %16 = arith.truncf %15 : vector<208x128xf32> to vector<208x128xbf16>
    %c0_7 = arith.constant 0 : index
    %c0_8 = arith.constant 0 : index
    %17 = vector.load %arg4[%c0_7, %c0_8] : memref<208x128xbf16, #tpu.memory_space<vmem>>, vector<208x128xbf16>
    tpu.vector_store %arg4[%c0_7, %c0_8], %16 {strides = array<i32>} : memref<208x128xbf16, #tpu.memory_space<vmem>>, vector<208x128xbf16>,
    return
  }
  func.func @transform_0(%arg0: i32) -> (i32, i32, i32) {
    %c0_i32 = arith.constant 0 : i32
    %c0_i32_0 = arith.constant 0 : i32
    %c0_i32_1 = arith.constant 0 : i32
    return %c0_i32, %arg0, %c0_i32_0 : i32, i32, i32
  }
  func.func @transform_1(%arg0: i32) -> (i32, i32) {
    %c0_i32 = arith.constant 0 : i32
    %c0_i32_0 = arith.constant 0 : i32
    %c0_i32_1 = arith.constant 0 : i32
    return %c0_i32, %c0_i32_0 : i32, i32
  }
  func.func @transform_2(%arg0: i32) -> (i32, i32) {
    %c0_i32 = arith.constant 0 : i32
    %c0_i32_0 = arith.constant 0 : i32
    %c0_i32_1 = arith.constant 0 : i32
    return %c0_i32, %c0_i32_0 : i32, i32
  }
  func.func @transform_3(%arg0: i32) -> (i32, i32) {
    %c0_i32 = arith.constant 0 : i32
    %c0_i32_0 = arith.constant 0 : i32
    return %arg0, %c0_i32 : i32, i32
  }
}

module attributes {stable_mosaic.version = 11 : i64} {
  func.func @_conv_pool_kernel(%arg0: i32, %arg1: memref<4x32x150xbf16, #tpu.memory_space<vmem>>, %arg2: memref<150x128xbf16, #tpu.memory_space<vmem>>, %arg3: memref<1x128xf32, #tpu.memory_space<vmem>>, %arg4: memref<32x128xbf16, #tpu.memory_space<vmem>>) attributes {dimension_semantics = [#tpu.dimension_semantics<parallel>], iteration_bounds = array<i64: 2>, scalar_prefetch = 0 : i64, scratch_operands = 0 : i64, tpu.core_type = #tpu.core_type<tc>, window_params = [{transform_indices = @transform_0, window_bounds = array<i64: 4, 32, 150>}, {pipeline_mode = #tpu.pipeline_mode<synchronous>, transform_indices = @transform_1, window_bounds = array<i64: 150, 128>}, {pipeline_mode = #tpu.pipeline_mode<synchronous>, transform_indices = @transform_2, window_bounds = array<i64: 1, 128>}, {transform_indices = @transform_3, window_bounds = array<i64: 32, 128>}]} {
    %c0 = arith.constant 0 : index
    %c0_0 = arith.constant 0 : index
    %c0_1 = arith.constant 0 : index
    %0 = vector.load %arg1[%c0, %c0_0, %c0_1] : memref<4x32x150xbf16, #tpu.memory_space<vmem>>, vector<4x32x150xbf16>
    %1 = vector.shape_cast %0 : vector<4x32x150xbf16> to vector<128x150xbf16>
    %c0_2 = arith.constant 0 : index
    %c0_3 = arith.constant 0 : index
    %2 = vector.load %arg2[%c0_2, %c0_3] : memref<150x128xbf16, #tpu.memory_space<vmem>>, vector<150x128xbf16>
    %cst = arith.constant dense<0.000000e+00> : vector<128x128xf32>
    %3 = tpu.matmul %1, %2, %cst {dimension_numbers = #tpu.dot_dimension_numbers<[1], [0], [0], [1], [0, 0, 1, 1], [], []>} : vector<128x150xbf16>, vector<150x128xbf16>, vector<128x128xf32> -> vector<128x128xf32>
    %4 = vector.extract_strided_slice %3 {offsets = [0, 0], sizes = [32, 128], strides = [1, 1]} : vector<128x128xf32> to vector<32x128xf32>
    %5 = vector.extract_strided_slice %3 {offsets = [32, 0], sizes = [32, 128], strides = [1, 1]} : vector<128x128xf32> to vector<32x128xf32>
    %6 = arith.maximumf %4, %5 : vector<32x128xf32>
    %7 = vector.extract_strided_slice %3 {offsets = [64, 0], sizes = [32, 128], strides = [1, 1]} : vector<128x128xf32> to vector<32x128xf32>
    %8 = vector.extract_strided_slice %3 {offsets = [96, 0], sizes = [32, 128], strides = [1, 1]} : vector<128x128xf32> to vector<32x128xf32>
    %9 = arith.maximumf %7, %8 : vector<32x128xf32>
    %10 = arith.maximumf %6, %9 : vector<32x128xf32>
    %c0_4 = arith.constant 0 : index
    %c0_5 = arith.constant 0 : index
    %11 = vector.load %arg3[%c0_4, %c0_5] : memref<1x128xf32, #tpu.memory_space<vmem>>, vector<1x128xf32>
    %12 = vector.broadcast %11 : vector<1x128xf32> to vector<32x128xf32>
    %13 = arith.addf %10, %12 : vector<32x128xf32>
    %cst_6 = arith.constant 0.000000e+00 : f32
    %14 = vector.broadcast %cst_6 : f32 to vector<32x128xf32>
    %15 = arith.maximumf %13, %14 : vector<32x128xf32>
    %16 = arith.truncf %15 : vector<32x128xf32> to vector<32x128xbf16>
    %c0_7 = arith.constant 0 : index
    %c0_8 = arith.constant 0 : index
    %17 = vector.load %arg4[%c0_7, %c0_8] : memref<32x128xbf16, #tpu.memory_space<vmem>>, vector<32x128xbf16>
    tpu.vector_store %arg4[%c0_7, %c0_8], %16 {strides = array<i32>} : memref<32x128xbf16, #tpu.memory_space<vmem>>, vector<32x128xbf16>,
    return
  }
  func.func @transform_0(%arg0: i32) -> (i32, i32, i32) {
    %c0_i32 = arith.constant 0 : i32
    %c0_i32_0 = arith.constant 0 : i32
    %c0_i32_1 = arith.constant 0 : i32
    return %c0_i32, %arg0, %c0_i32_0 : i32, i32, i32
  }
  func.func @transform_1(%arg0: i32) -> (i32, i32) {
    %c0_i32 = arith.constant 0 : i32
    %c0_i32_0 = arith.constant 0 : i32
    %c0_i32_1 = arith.constant 0 : i32
    return %c0_i32, %c0_i32_0 : i32, i32
  }
  func.func @transform_2(%arg0: i32) -> (i32, i32) {
    %c0_i32 = arith.constant 0 : i32
    %c0_i32_0 = arith.constant 0 : i32
    %c0_i32_1 = arith.constant 0 : i32
    return %c0_i32, %c0_i32_0 : i32, i32
  }
  func.func @transform_3(%arg0: i32) -> (i32, i32) {
    %c0_i32 = arith.constant 0 : i32
    %c0_i32_0 = arith.constant 0 : i32
    return %arg0, %c0_i32 : i32, i32
  }
}

module attributes {stable_mosaic.version = 11 : i64} {
  func.func @_fc_head_kernel(%arg0: i32, %arg1: memref<2x3200xbf16, #tpu.memory_space<vmem>>, %arg2: memref<3200x128xbf16, #tpu.memory_space<vmem>>, %arg3: memref<1x128xf32, #tpu.memory_space<vmem>>, %arg4: memref<128x128xbf16, #tpu.memory_space<vmem>>, %arg5: memref<1x128xf32, #tpu.memory_space<vmem>>, %arg6: memref<128x128xbf16, #tpu.memory_space<vmem>>, %arg7: memref<1x128xf32, #tpu.memory_space<vmem>>, %arg8: memref<2x128xf32, #tpu.memory_space<vmem>>) attributes {dimension_semantics = [#tpu.dimension_semantics<parallel>], iteration_bounds = array<i64: 1>, scalar_prefetch = 0 : i64, scratch_operands = 0 : i64, tpu.core_type = #tpu.core_type<tc>, window_params = [{transform_indices = @transform_0, window_bounds = array<i64: 2, 3200>}, {pipeline_mode = #tpu.pipeline_mode<synchronous>, transform_indices = @transform_1, window_bounds = array<i64: 3200, 128>}, {pipeline_mode = #tpu.pipeline_mode<synchronous>, transform_indices = @transform_2, window_bounds = array<i64: 1, 128>}, {pipeline_mode = #tpu.pipeline_mode<synchronous>, transform_indices = @transform_3, window_bounds = array<i64: 128, 128>}, {pipeline_mode = #tpu.pipeline_mode<synchronous>, transform_indices = @transform_4, window_bounds = array<i64: 1, 128>}, {pipeline_mode = #tpu.pipeline_mode<synchronous>, transform_indices = @transform_5, window_bounds = array<i64: 128, 128>}, {pipeline_mode = #tpu.pipeline_mode<synchronous>, transform_indices = @transform_6, window_bounds = array<i64: 1, 128>}, {transform_indices = @transform_7, window_bounds = array<i64: 2, 128>}]} {
    %c0 = arith.constant 0 : index
    %c0_0 = arith.constant 0 : index
    %0 = vector.load %arg1[%c0, %c0_0] : memref<2x3200xbf16, #tpu.memory_space<vmem>>, vector<2x3200xbf16>
    %c0_1 = arith.constant 0 : index
    %c0_2 = arith.constant 0 : index
    %1 = vector.load %arg2[%c0_1, %c0_2] : memref<3200x128xbf16, #tpu.memory_space<vmem>>, vector<3200x128xbf16>
    %cst = arith.constant dense<0.000000e+00> : vector<2x128xf32>
    %2 = tpu.matmul %0, %1, %cst {dimension_numbers = #tpu.dot_dimension_numbers<[1], [0], [0], [1], [0, 0, 1, 1], [], []>} : vector<2x3200xbf16>, vector<3200x128xbf16>, vector<2x128xf32> -> vector<2x128xf32>
    %c0_3 = arith.constant 0 : index
    %c0_4 = arith.constant 0 : index
    %3 = vector.load %arg3[%c0_3, %c0_4] : memref<1x128xf32, #tpu.memory_space<vmem>>, vector<1x128xf32>
    %4 = vector.broadcast %3 : vector<1x128xf32> to vector<2x128xf32>
    %5 = arith.addf %2, %4 : vector<2x128xf32>
    %cst_5 = arith.constant 0.000000e+00 : f32
    %6 = vector.broadcast %cst_5 : f32 to vector<2x128xf32>
    %7 = arith.maximumf %5, %6 : vector<2x128xf32>
    %8 = arith.truncf %7 : vector<2x128xf32> to vector<2x128xbf16>
    %c0_6 = arith.constant 0 : index
    %c0_7 = arith.constant 0 : index
    %9 = vector.load %arg4[%c0_6, %c0_7] : memref<128x128xbf16, #tpu.memory_space<vmem>>, vector<128x128xbf16>
    %cst_8 = arith.constant dense<0.000000e+00> : vector<2x128xf32>
    %10 = tpu.matmul %8, %9, %cst_8 {dimension_numbers = #tpu.dot_dimension_numbers<[1], [0], [0], [1], [0, 0, 1, 1], [], []>} : vector<2x128xbf16>, vector<128x128xbf16>, vector<2x128xf32> -> vector<2x128xf32>
    %c0_9 = arith.constant 0 : index
    %c0_10 = arith.constant 0 : index
    %11 = vector.load %arg5[%c0_9, %c0_10] : memref<1x128xf32, #tpu.memory_space<vmem>>, vector<1x128xf32>
    %12 = vector.broadcast %11 : vector<1x128xf32> to vector<2x128xf32>
    %13 = arith.addf %10, %12 : vector<2x128xf32>
    %cst_11 = arith.constant 0.000000e+00 : f32
    %14 = vector.broadcast %cst_11 : f32 to vector<2x128xf32>
    %15 = arith.maximumf %13, %14 : vector<2x128xf32>
    %16 = arith.truncf %15 : vector<2x128xf32> to vector<2x128xbf16>
    %c0_12 = arith.constant 0 : index
    %c0_13 = arith.constant 0 : index
    %17 = vector.load %arg6[%c0_12, %c0_13] : memref<128x128xbf16, #tpu.memory_space<vmem>>, vector<128x128xbf16>
    %cst_14 = arith.constant dense<0.000000e+00> : vector<2x128xf32>
    %18 = tpu.matmul %16, %17, %cst_14 {dimension_numbers = #tpu.dot_dimension_numbers<[1], [0], [0], [1], [0, 0, 1, 1], [], []>} : vector<2x128xbf16>, vector<128x128xbf16>, vector<2x128xf32> -> vector<2x128xf32>
    %c0_15 = arith.constant 0 : index
    %c0_16 = arith.constant 0 : index
    %19 = vector.load %arg7[%c0_15, %c0_16] : memref<1x128xf32, #tpu.memory_space<vmem>>, vector<1x128xf32>
    %20 = vector.broadcast %19 : vector<1x128xf32> to vector<2x128xf32>
    %21 = arith.addf %18, %20 : vector<2x128xf32>
    %c0_17 = arith.constant 0 : index
    %c0_18 = arith.constant 0 : index
    %22 = vector.load %arg8[%c0_17, %c0_18] : memref<2x128xf32, #tpu.memory_space<vmem>>, vector<2x128xf32>
    tpu.vector_store %arg8[%c0_17, %c0_18], %21 {strides = array<i32>} : memref<2x128xf32, #tpu.memory_space<vmem>>, vector<2x128xf32>,
    return
  }
  func.func @transform_0(%arg0: i32) -> (i32, i32) {
    %c0_i32 = arith.constant 0 : i32
    %c0_i32_0 = arith.constant 0 : i32
    return %arg0, %c0_i32 : i32, i32
  }
  func.func @transform_1(%arg0: i32) -> (i32, i32) {
    %c0_i32 = arith.constant 0 : i32
    %c0_i32_0 = arith.constant 0 : i32
    %c0_i32_1 = arith.constant 0 : i32
    return %c0_i32, %c0_i32_0 : i32, i32
  }
  func.func @transform_2(%arg0: i32) -> (i32, i32) {
    %c0_i32 = arith.constant 0 : i32
    %c0_i32_0 = arith.constant 0 : i32
    %c0_i32_1 = arith.constant 0 : i32
    return %c0_i32, %c0_i32_0 : i32, i32
  }
  func.func @transform_3(%arg0: i32) -> (i32, i32) {
    %c0_i32 = arith.constant 0 : i32
    %c0_i32_0 = arith.constant 0 : i32
    %c0_i32_1 = arith.constant 0 : i32
    return %c0_i32, %c0_i32_0 : i32, i32
  }
  func.func @transform_4(%arg0: i32) -> (i32, i32) {
    %c0_i32 = arith.constant 0 : i32
    %c0_i32_0 = arith.constant 0 : i32
    %c0_i32_1 = arith.constant 0 : i32
    return %c0_i32, %c0_i32_0 : i32, i32
  }
  func.func @transform_5(%arg0: i32) -> (i32, i32) {
    %c0_i32 = arith.constant 0 : i32
    %c0_i32_0 = arith.constant 0 : i32
    %c0_i32_1 = arith.constant 0 : i32
    return %c0_i32, %c0_i32_0 : i32, i32
  }
  func.func @transform_6(%arg0: i32) -> (i32, i32) {
    %c0_i32 = arith.constant 0 : i32
    %c0_i32_0 = arith.constant 0 : i32
    %c0_i32_1 = arith.constant 0 : i32
    return %c0_i32, %c0_i32_0 : i32, i32
  }
  func.func @transform_7(%arg0: i32) -> (i32, i32) {
    %c0_i32 = arith.constant 0 : i32
    %c0_i32_0 = arith.constant 0 : i32
    return %arg0, %c0_i32 : i32, i32
  }
}

</mosaic_0001>

<bundles_post_ra>
// kernel: net_forward.3
= control target key start
LH: loop header
LB: loop body
LE: loop exit
PB: predicated region body
PF: predicated region fallthrough
CT: control target
= control target key end

     0   :  { %s2667_s12 = smov 0   ;;  %s2669_s13 = smov 0   ;;  %s3157_s0 = inlined_call_operand.vmem [shape: bf16[4,392,75], index: 0, kind: input, shape index: {}]   ;;  %s3158_s1 = inlined_call_operand.vmem [shape: bf16[75,128], index: 1, kind: input, shape index: {}]   ;;  %s3159_s2 = inlined_call_operand.vmem [shape: f32[1,128], index: 2, kind: input, shape index: {}]   ;;  %s3160_s3 = inlined_call_operand.vmem [shape: bf16[392,128], index: 3, kind: output, shape index: {}]  }
   0x1   :  { %s2671_s14 = smov 0  }
   0x2 LB: > { %s2683_s15 = sadd.s32 4294967295, %s2580_s14   ;;  %s2686_s16 = sadd.s32 1, %s2580_s14   ;;  %s2580_s14 = sphi %s2671_s14, %s3176_s14   ;;  %s2576_s13 = sphi %s2669_s13, %s3175_s13   ;;  %s2572_s12 = sphi %s2667_s12, %s3174_s12  }
   0x3   : > { %s17_s17 = ssub.s32 %s2580_s14, %s2686_s16  ;;  %s20_s18 = sadd.s32 1, %s2576_s13 }
   0x4   : > { %p18_p0 = scmp.eq.s32.totalorder %s17_s17, 0  ;;  %p27_p1 = scmp.ne.s32.totalorder %s2576_s13, %s2572_s12 }
   0x5   : > { %p28_p2 = scmp.eq.s32.totalorder %s2580_s14, 0  ;;  %p99_p3 = scmp.eq.s32.totalorder %s2683_s15, 1 }
   0x6   : > { %s2696_s19 = scalar_select %p18_p0, %s2576_s13, %s20_s18  }
   0x7   : > { %p29_p4 = por %p28_p2, %p27_p1  ;;  %p2698_p5 = por %p99_p3, %p27_p1 }
   0x8   : > { %p1870_p6 = scmp.ge.s32.totalorder %s2580_s14, 2 }
   0xa   : > { %127 = sbr.rel (%p1870_p6) target bundleno = 86 (0x56), region = 24 }
   0xf   : > { %130 = sbr.rel (!%p29_p4) target bundleno = 86 (0x56), region = 28  ;;  %s132_s21 = sand.u32 (%p29_p4), 1, %s2576_s13  }
  0x10   : > { %s135_s22 = smul.u32 (%p29_p4), 26, %s2580_s14 }
  0x11   : > { %s2330_s23 = smul.u32 (%p29_p4), 416, %s132_s21 }
  0x12   : > { %s136_s24 = ssub.s32 (%p29_p4), 49, %s135_s22  ;;  %s2177_s25 = smul.u32 (%p29_p4), 104, %s2580_s14 }
  0x13   : > { %p137_p7 = scmp.lt.s32.totalorder (%p29_p4), %s136_s24, 26  ;;  %s2714_s30 = scalar_lea.vmem (%p29_p4), [#allocation2], %s2330_s23  }
  0x14   : > { %s2709_s28 = scalar_lea.vmem %s3157_s0, %s2177_s25  }
  0x15   : > { %s3178_s24 = smov (!%p137_p7, %s136_s24), 26 }
  0x16   : > { %s1871_s29 = sshll.u32 %s3178_s24, 4 }
  0x17   : > { %p1874_p8 = scmp.eq.s32.totalorder %s1871_s29, 0 }
  0x18   : > { %s2717_s4 = sshrl.u32 (!%p1874_p8), %s3178_s24, 3 }
  0x19   : > { %145 = sbr.rel (%p1874_p8) target bundleno = 86 (0x56), region = 32  ;;  %p1875_p9 = scmp.le.s32.totalorder (!%p1874_p8), %s2717_s4, 0 }
  0x1e   : > { %1796 = sbr.rel (%p1875_p9) target bundleno = 68 (0x44), region = 193  ;;  %s3162_s5 = smov (!%p1875_p9), %s2714_s30 }
  0x1f   : > { %s3163_s6 = smov (!%p1875_p9), %s2709_s28  ;;  %s2726_s7 = smov (!%p1875_p9), 0  }
  0x20   : > { %s2728_s8 = smov (!%p1875_p9), 0  }
  0x23 LB: >> { %v162_v0 = vld [vmem:[%s2588_s6] sm:$0xf]  ;;  %v164_v1 = vld [vmem:[%s2588_s6 + $0x4] sm:$0xf]  ;;  %v166_v2 = vld [vmem:[%s2588_s6 + $0x8] sm:$0xf]  ;;  %s2596_s8 = sphi %s2728_s8, %s156_s8   ;;  %s2592_s7 = sphi %s2726_s7, %s3166_s7   ;;  %s2588_s6 = sphi %s3163_s6, %s3165_s6   ;;  %s2584_s5 = sphi %s3162_s5, %s3164_s5  }
  0x24   : >> { %163 = vst [vmem:[%s2584_s5] sm:$0xf] %v162_v0  ;;  %v168_v3 = vld [vmem:[%s2588_s6 + $0xc] sm:$0xf]  ;;  %v170_v4 = vld [vmem:[%s2588_s6 + $0x10] sm:$0xf]  ;;  %s226_s9 = sadd.s32 1, %s2592_s7 }
  0x25   : >> { %165 = vst [vmem:[%s2584_s5 + $0x4] sm:$0xf] %v164_v1  ;;  %v172_v5 = vld [vmem:[%s2588_s6 + $0x14] sm:$0xf]  ;;  %v174_v6 = vld [vmem:[%s2588_s6 + $0x18] sm:$0xf]  ;;  %p227_p10 = scmp.ge.s32.totalorder %s226_s9, %s2717_s4 }
  0x26   : >> { %167 = vst [vmem:[%s2584_s5 + $0x8] sm:$0xf] %v166_v2  ;;  %v176_v7 = vld [vmem:[%s2588_s6 + $0x1c] sm:$0xf]  ;;  %v178_v8 = vld [vmem:[%s2588_s6 + $0xc4] sm:$0xf] }
  0x27   : >> { %169 = vst [vmem:[%s2584_s5 + $0xc] sm:$0xf] %v168_v3  ;;  %v180_v9 = vld [vmem:[%s2588_s6 + $0xc8] sm:$0xf]  ;;  %v182_v10 = vld [vmem:[%s2588_s6 + $0xcc] sm:$0xf] }
  0x28   : >> { %171 = vst [vmem:[%s2584_s5 + $0x10] sm:$0xf] %v170_v4  ;;  %v184_v11 = vld [vmem:[%s2588_s6 + $0xd0] sm:$0xf]  ;;  %v186_v12 = vld [vmem:[%s2588_s6 + $0xd4] sm:$0xf] }
  0x29   : >> { %173 = vst [vmem:[%s2584_s5 + $0x14] sm:$0xf] %v172_v5  ;;  %v188_v13 = vld [vmem:[%s2588_s6 + $0xd8] sm:$0xf]  ;;  %v190_v14 = vld [vmem:[%s2588_s6 + $0xdc] sm:$0xf] }
  0x2a   : >> { %175 = vst [vmem:[%s2584_s5 + $0x18] sm:$0xf] %v174_v6  ;;  %v192_v15 = vld [vmem:[%s2588_s6 + $0xe0] sm:$0xf]  ;;  %v194_v16 = vld [vmem:[%s2588_s6 + $0x188] sm:$0xf] }
  0x2b   : >> { %177 = vst [vmem:[%s2584_s5 + $0x1c] sm:$0xf] %v176_v7  ;;  %v196_v17 = vld [vmem:[%s2588_s6 + $0x18c] sm:$0xf]  ;;  %s3180_s9 = smov (%p227_p10, %s226_s9), 0  ;;  %s156_s8 = sadd.s32 1, %s2596_s8  }
  0x2c   : >> { %179 = vst [vmem:[%s2584_s5 + $0x68] sm:$0xf] %v178_v8  ;;  %v198_v18 = vld [vmem:[%s2588_s6 + $0x190] sm:$0xf]  ;;  %v200_v19 = vld [vmem:[%s2588_s6 + $0x194] sm:$0xf]  ;;  %p155_p11 = scmp.ge.s32.totalorder %s156_s8, %s2717_s4  ;;  %s3166_s7 = smov %s3180_s9 }
  0x2d   : >> { %181 = vst [vmem:[%s2584_s5 + $0x6c] sm:$0xf] %v180_v9  ;;  %s1876_s10 = sshll.u32 %s3180_s9, 5  ;;  %v202_v20 = vld [vmem:[%s2588_s6 + $0x198] sm:$0xf] }
  0x2e   : >> { %183 = vst [vmem:[%s2584_s5 + $0x70] sm:$0xf] %v182_v10  ;;  %s2787_s11 = scalar_lea.vmem %s2709_s28, %s1876_s10   ;;  %s232_s17 = scalar_lea.vmem %s2714_s30, %s1876_s10 [#allocation2]   ;;  %v204_v21 = vld [vmem:[%s2588_s6 + $0x19c] sm:$0xf]  ;;  %v206_v22 = vld [vmem:[%s2588_s6 + $0x1a0] sm:$0xf] }
  0x2f   : >> { %185 = vst [vmem:[%s2584_s5 + $0x74] sm:$0xf] %v184_v11  ;;  %v208_v23 = vld [vmem:[%s2588_s6 + $0x1a4] sm:$0xf]  ;;  %v210_v24 = vld [vmem:[%s2588_s6 + $0x24c] sm:$0xf] }
  0x30   : >> { %187 = vst [vmem:[%s2584_s5 + $0x78] sm:$0xf] %v186_v12  ;;  %v212_v25 = vld [vmem:[%s2588_s6 + $0x250] sm:$0xf]  ;;  %v214_v26 = vld [vmem:[%s2588_s6 + $0x254] sm:$0xf] }
  0x31   : >> { %189 = vst [vmem:[%s2584_s5 + $0x7c] sm:$0xf] %v188_v13  ;;  %v216_v27 = vld [vmem:[%s2588_s6 + $0x258] sm:$0xf]  ;;  %v218_v28 = vld [vmem:[%s2588_s6 + $0x25c] sm:$0xf] }
  0x32   : >> { %191 = vst [vmem:[%s2584_s5 + $0x80] sm:$0xf] %v190_v14  ;;  %v220_v29 = vld [vmem:[%s2588_s6 + $0x260] sm:$0xf]  ;;  %v222_v30 = vld [vmem:[%s2588_s6 + $0x264] sm:$0xf] }
  0x33   : >> { %193 = vst [vmem:[%s2584_s5 + $0x84] sm:$0xf] %v192_v15  ;;  %v224_v31 = vld [vmem:[%s2588_s6 + $0x268] sm:$0xf]  ;;  %s3165_s6 = smov %s2787_s11 }
  0x34   : >> { %195 = vst [vmem:[%s2584_s5 + $0xd0] sm:$0xf] %v194_v16 }
  0x35   : >> { %197 = vst [vmem:[%s2584_s5 + $0xd4] sm:$0xf] %v196_v17 }
  0x36   : >> { %199 = vst [vmem:[%s2584_s5 + $0xd8] sm:$0xf] %v198_v18 }
  0x37   : >> { %201 = vst [vmem:[%s2584_s5 + $0xdc] sm:$0xf] %v200_v19 }
  0x38   : >> { %203 = vst [vmem:[%s2584_s5 + $0xe0] sm:$0xf] %v202_v20 }
  0x39   : >> { %205 = vst [vmem:[%s2584_s5 + $0xe4] sm:$0xf] %v204_v21 }
  0x3a   : >> { %207 = vst [vmem:[%s2584_s5 + $0xe8] sm:$0xf] %v206_v22 }
  0x3b   : >> { %209 = vst [vmem:[%s2584_s5 + $0xec] sm:$0xf] %v208_v23 }
  0x3c   : >> { %211 = vst [vmem:[%s2584_s5 + $0x138] sm:$0xf] %v210_v24 }
  0x3d   : >> { %213 = vst [vmem:[%s2584_s5 + $0x13c] sm:$0xf] %v212_v25 }
  0x3e   : >> { %215 = vst [vmem:[%s2584_s5 + $0x140] sm:$0xf] %v214_v26 }
  0x3f   : >> { %217 = vst [vmem:[%s2584_s5 + $0x144] sm:$0xf] %v216_v27  ;;  %158 = sbr.rel (!%p155_p11) target bundleno = 35 (0x23), region = 199 }
  0x40   : >> { %219 = vst [vmem:[%s2584_s5 + $0x148] sm:$0xf] %v218_v28 }
  0x41   : >> { %221 = vst [vmem:[%s2584_s5 + $0x14c] sm:$0xf] %v220_v29 }
  0x42   : >> { %223 = vst [vmem:[%s2584_s5 + $0x150] sm:$0xf] %v222_v30 }
  0x43   : >> { %225 = vst [vmem:[%s2584_s5 + $0x154] sm:$0xf] %v224_v31  ;;  %s3164_s5 = smov %s232_s17 }
  0x44 PF: > { %s2828_s18 = sand.u32 7, %s3178_s24   ;;  %s2178_s21 = sshll.u32 %s2717_s4, 5 }
  0x45   : > { %s2832_s22 = scalar_lea.vmem %s2709_s28, %s2178_s21   ;;  %s2835_s23 = scalar_lea.vmem %s2714_s30, %s2178_s21 [#allocation2]  }
  0x46   : > { %p1881_p12 = scmp.le.s32.totalorder %s2828_s18, 0 }
  0x47   : > { %s3167_s25 = smov (!%p1881_p12), %s2835_s23  ;;  %s3168_s26 = smov (!%p1881_p12), %s2832_s22 }
  0x48   : > { %1810 = sbr.rel (%p1881_p12) target bundleno = 86 (0x56), region = 204  ;;  %s2606_s27 = smov (!%p1881_p12), 0  }
  0x49   : > { %s2610_s29 = smov (!%p1881_p12), 0  }
  0x4d LB: >> { %v249_v32 = vld [vmem:[%s2604_s26] sm:$0xf]  ;;  %v251_v33 = vld [vmem:[%s2604_s26 + $0xc4] sm:$0xf]  ;;  %v253_v34 = vld [vmem:[%s2604_s26 + $0x188] sm:$0xf]  ;;  %s2612_s29 = sphi %s2610_s29, %s243_s29   ;;  %s2608_s27 = sphi %s2606_s27, %s2607_s27   ;;  %s2604_s26 = sphi %s3168_s26, %s262_s26   ;;  %s2600_s25 = sphi %s3167_s25, %s263_s25  }
  0x4e   : >> { %250 = vst [vmem:[%s2600_s25] sm:$0xf] %v249_v32  ;;  %v255_v35 = vld [vmem:[%s2604_s26 + $0x24c] sm:$0xf]  ;;  %s257_s24 = sadd.s32 1, %s2608_s27  ;;  %s243_s29 = sadd.s32 1, %s2612_s29  }
  0x4f   : >> { %252 = vst [vmem:[%s2600_s25 + $0x68] sm:$0xf] %v251_v33  ;;  %p258_p13 = scmp.ge.s32.totalorder %s257_s24, %s2828_s18  ;;  %p242_p0 = scmp.ge.s32.totalorder %s243_s29, %s2828_s18 }
  0x50   : >> { %254 = vst [vmem:[%s2600_s25 + $0xd0] sm:$0xf] %v253_v34 }
  0x51   : >> { %256 = vst [vmem:[%s2600_s25 + $0x138] sm:$0xf] %v255_v35  ;;  %s3182_s24 = smov (%p258_p13, %s257_s24), 0  ;;  %245 = sbr.rel (!%p242_p0) target bundleno = 77 (0x4d), region = 210 }
  0x52   : >> { %s1882_s28 = sshll.u32 %s3182_s24, 2  ;;  %s2607_s27 = smov %s3182_s24  }
  0x53   : >> { %s262_s26 = scalar_lea.vmem %s2832_s22, %s1882_s28   ;;  %s263_s25 = scalar_lea.vmem %s2835_s23, %s1882_s28 [#allocation2]  }
  0x56 PF: > { %p1884_p1 = scmp.ge.s32.totalorder %s2580_s14, 1  ;;  %p422_p2 = scmp.lt.s32.totalorder %s2580_s14, 3 }
  0x58   : > { %p423_p3 = pnand %p1884_p1, %p422_p2 }
  0x59   : > { %s429_s10 = sand.u32 (!%p423_p3), 1, %s2572_s12  }
  0x5a   : > { %426 = sbr.rel (%p423_p3) target bundleno = 537 (0x219), region = 90 }
  0x5b   : > { %s2331_s18 = smul.u32 (!%p423_p3), 416, %s429_s10 }
  0x5c   : > { %s2332_s27 = smul.u32 (!%p423_p3), 104, %s429_s10 }
  0x5d   : > { %s2877_s23 = scalar_lea.vmem (!%p423_p3), [#allocation2], %s2331_s18 }
  0x5e   : > { %s2968_s12 = scalar_lea.vmem (!%p423_p3), [#allocation3], %s2332_s27  }
  0x5f   : > { %v2111_v36 = vld [vmem:[%s3158_s1 + $0x20] sm:$0xf]  ;;  %v2236_v37 = vld [vmem:[%s3158_s1 + $0x20] sm:$0x30]  ;;  %vm1022_vm0 = vcmask 1044480   ;;  %vm1023_vm1 = vcmask 1045504  }
  0x60   : > { %v2112_v38 = vor.u32 %v2236_v37, %v2111_v36  ;;  %v2646_v39 = vmov 65535   ;;  %v2235_v43 = vld [vmem:[%s3158_s1 + $0x18] sm:$0xff]  ;;  %v2234_v44 = vld [vmem:[%s3158_s1 + $0x10] sm:$0xff]  ;;  %v2233_v45 = vld [vmem:[%s3158_s1 + $0x8] sm:$0xff]  ;;  %vm865_vm2 = vcmask 613376   ;;  %s1491_s29 = smul.u32 (%p2698_p5), 26, %s2683_s15 }
  0x61   : > { %v1024_v40 = vsel %vm1022_vm0, 4294967295, %v2646_v39  ;;  %v2232_v46 = vld [vmem:[%s3158_s1] sm:$0xff]  ;;  %v2193_v48 = vld [vmem:[%s2877_s23 + $0x68] sm:$0xff]  ;;  %v2206_v49 = vld [vmem:[%s2877_s23 + $0xd0] sm:$0xff]  ;;  %s2237_s24 = smul.u32 (%p2698_p5), 104, %s2683_s15 }
  0x62   : > { %v1025_v41 = vsel %vm1023_vm1, %v1024_v40, 0  ;;  %v2180_v47 = vld [vmem:[%s2877_s23] sm:$0xff]  ;;  %v2219_v50 = vld [vmem:[%s2877_s23 + $0x138] sm:$0xff]  ;;  %v2181_v51 = vld [vmem:[%s2877_s23 + $0x8] sm:$0xff]  ;;  %s1492_s28 = ssub.s32 (%p2698_p5), 49, %s1491_s29 }
  0x63   : > { %v1027_v42 = vand.u32 %v2112_v38, %v1025_v41  ;;  %v2194_v52 = vld [vmem:[%s2877_s23 + $0x70] sm:$0xff]  ;;  %v2207_v53 = vld [vmem:[%s2877_s23 + $0xd8] sm:$0xff]  ;;  %v2220_v54 = vld [vmem:[%s2877_s23 + $0x140] sm:$0xff]  ;;  %p1493_p4 = scmp.lt.s32.totalorder (%p2698_p5), %s1492_s28, 26  ;;  %s3038_s5 = scalar_lea.vmem (%p2698_p5), %s3160_s3, %s2237_s24  }
  0x64   : > { %v2182_v55 = vld [vmem:[%s2877_s23 + $0x10] sm:$0xff]  ;;  %v2195_v56 = vld [vmem:[%s2877_s23 + $0x78] sm:$0xff]  ;;  %v2208_v57 = vld [vmem:[%s2877_s23 + $0xe0] sm:$0xff] }
  0x65   : > { %1032 = vmatpush.bf16.msra.mxu0 %v1027_v42  ;;  %2315 = vmatpush.bf16.msra.mxu1 %v1027_v42  ;;  %v2221_v58 = vld [vmem:[%s2877_s23 + $0x148] sm:$0xff]  ;;  %v2183_v59 = vld [vmem:[%s2877_s23 + $0x18] sm:$0xff]  ;;  %v2196_v60 = vld [vmem:[%s2877_s23 + $0x80] sm:$0xff] }
  0x66   : > { %2316 = vmatpush.bf16.msra.mxu2 %v1027_v42  ;;  %2317 = vmatpush.bf16.msra.mxu3 %v1027_v42  ;;  %v2209_v61 = vld [vmem:[%s2877_s23 + $0xe8] sm:$0xff]  ;;  %v2222_v62 = vld [vmem:[%s2877_s23 + $0x150] sm:$0xff]  ;;  %v2184_v63 = vld [vmem:[%s2877_s23 + $0x20] sm:$0xff] }
  0x67   : > { %v2197_v0 = vld [vmem:[%s2877_s23 + $0x88] sm:$0xff]  ;;  %v2210_v1 = vld [vmem:[%s2877_s23 + $0xf0] sm:$0xff]  ;;  %v2223_v2 = vld [vmem:[%s2877_s23 + $0x158] sm:$0xff] }
  0x68   : > { %v2185_v3 = vld [vmem:[%s2877_s23 + $0x28] sm:$0xff]  ;;  %v2198_v4 = vld [vmem:[%s2877_s23 + $0x90] sm:$0xff]  ;;  %v2211_v5 = vld [vmem:[%s2877_s23 + $0xf8] sm:$0xff] }
  0x69   : > { %1033 = vmatpush.bf16.msra.mxu0 %v2235_v43  ;;  %2318 = vmatpush.bf16.msra.mxu1 %v2235_v43  ;;  %v2224_v6 = vld [vmem:[%s2877_s23 + $0x160] sm:$0xff]  ;;  %v2186_v7 = vld [vmem:[%s2877_s23 + $0x30] sm:$0xff]  ;;  %v2199_v8 = vld [vmem:[%s2877_s23 + $0x98] sm:$0xff] }
  0x6a   : > { %2319 = vmatpush.bf16.msra.mxu2 %v2235_v43  ;;  %2320 = vmatpush.bf16.msra.mxu3 %v2235_v43  ;;  %v2212_v9 = vld [vmem:[%s2877_s23 + $0x100] sm:$0xff]  ;;  %v2225_v10 = vld [vmem:[%s2877_s23 + $0x168] sm:$0xff]  ;;  %v2187_v11 = vld [vmem:[%s2877_s23 + $0x38] sm:$0xff] }
  0x6b   : > { %v2200_v12 = vld [vmem:[%s2877_s23 + $0xa0] sm:$0xff]  ;;  %v2213_v13 = vld [vmem:[%s2877_s23 + $0x108] sm:$0xff]  ;;  %v2226_v14 = vld [vmem:[%s2877_s23 + $0x170] sm:$0xff] }
  0x6c   : > { %v2188_v15 = vld [vmem:[%s2877_s23 + $0x40] sm:$0xff]  ;;  %v2201_v16 = vld [vmem:[%s2877_s23 + $0xa8] sm:$0xff]  ;;  %v2214_v19 = vld [vmem:[%s2877_s23 + $0x110] sm:$0xff] }
  0x6d   : > { %1034 = vmatpush.bf16.msra.mxu0 %v2234_v44  ;;  %2321 = vmatpush.bf16.msra.mxu1 %v2234_v44  ;;  %v2227_v20 = vld [vmem:[%s2877_s23 + $0x178] sm:$0xff]  ;;  %v2954_v28 = vld [vmem:[%s3159_s2] ss:$0 sm:$0xff]  ;;  %v2189_v31 = vld [vmem:[%s2877_s23 + $0x48] sm:$0xff] }
  0x6e   : > { %2322 = vmatpush.bf16.msra.mxu2 %v2234_v44  ;;  %2323 = vmatpush.bf16.msra.mxu3 %v2234_v44  ;;  %v2202_v32 = vld [vmem:[%s2877_s23 + $0xb0] sm:$0xff]  ;;  %v2215_v37 = vld [vmem:[%s2877_s23 + $0x118] sm:$0xff]  ;;  %v2228_v38 = vld [vmem:[%s2877_s23 + $0x180] sm:$0xff] }
  0x71   : > { %1035 = vmatpush.bf16.msra.mxu0 %v2233_v45  ;;  %2324 = vmatpush.bf16.msra.mxu1 %v2233_v45 }
  0x72   : > { %2325 = vmatpush.bf16.msra.mxu2 %v2233_v45  ;;  %2326 = vmatpush.bf16.msra.mxu3 %v2233_v45 }
  0x75   : > { %1036 = vmatpush.bf16.msra.mxu0 %v2232_v46  ;;  %2327 = vmatpush.bf16.msra.mxu1 %v2232_v46 }
  0x76   : > { %2328 = vmatpush.bf16.msra.mxu2 %v2232_v46  ;;  %2329 = vmatpush.bf16.msra.mxu3 %v2232_v46 }
  0x78   : > { %2113 = vmatmul.msk.bf16.vlgmr.msra.gmra.mxu0 %vm865_vm2, %v2180_v47  ;;  %2126 = vmatmul.msk.bf16.vlgmr.msra.gmra.mxu1 %vm865_vm2, %v2193_v48 }
  0x79   : > { %2139 = vmatmul.msk.bf16.vlgmr.msra.gmra.mxu2 %vm865_vm2, %v2206_v49  ;;  %2152 = vmatmul.msk.bf16.vlgmr.msra.gmra.mxu3 %vm865_vm2, %v2219_v50 }
  0x88   : > { %2114 = vmatmul.msk.bf16.gmra.mxu0 %vm865_vm2, %v2181_v51  ;;  %2127 = vmatmul.msk.bf16.gmra.mxu1 %vm865_vm2, %v2194_v52 }
  0x89   : > { %2140 = vmatmul.msk.bf16.gmra.mxu2 %vm865_vm2, %v2207_v53  ;;  %2153 = vmatmul.msk.bf16.gmra.mxu3 %vm865_vm2, %v2220_v54  ;;  %v2190_v54 = vld [vmem:[%s2877_s23 + $0x50] sm:$0xff] }
  0x98   : > { %2115 = vmatmul.msk.bf16.gmra.mxu0 %vm865_vm2, %v2182_v55  ;;  %2128 = vmatmul.msk.bf16.gmra.mxu1 %vm865_vm2, %v2195_v56  ;;  %v2203_v55 = vld [vmem:[%s2877_s23 + $0xb8] sm:$0xff] }
  0x99   : > { %2141 = vmatmul.msk.bf16.gmra.mxu2 %vm865_vm2, %v2208_v57  ;;  %2154 = vmatmul.msk.bf16.gmra.mxu3 %vm865_vm2, %v2221_v58 }
  0xa8   : > { %2116 = vmatmul.msk.bf16.gmra.mxu0 %vm865_vm2, %v2183_v59  ;;  %2129 = vmatmul.msk.bf16.gmra.mxu1 %vm865_vm2, %v2196_v60  ;;  %v2216_v60 = vld [vmem:[%s2877_s23 + $0x120] sm:$0xff] }
  0xa9   : > { %2142 = vmatmul.msk.bf16.gmra.mxu2 %vm865_vm2, %v2209_v61  ;;  %2155 = vmatmul.msk.bf16.gmra.mxu3 %vm865_vm2, %v2222_v62  ;;  %v2229_v61 = vld [vmem:[%s2877_s23 + $0x188] sm:$0xff] }
  0xb8   : > { %2117 = vmatmul.msk.bf16.gmra.mxu0 %vm865_vm2, %v2184_v63  ;;  %2130 = vmatmul.msk.bf16.gmra.mxu1 %vm865_vm2, %v2197_v0 }
  0xb9   : > { %2143 = vmatmul.msk.bf16.gmra.mxu2 %vm865_vm2, %v2210_v1  ;;  %2156 = vmatmul.msk.bf16.gmra.mxu3 %vm865_vm2, %v2223_v2 }
  0xc8   : > { %2118 = vmatmul.msk.bf16.gmra.mxu0 %vm865_vm2, %v2185_v3  ;;  %2131 = vmatmul.msk.bf16.gmra.mxu1 %vm865_vm2, %v2198_v4 }
  0xc9   : > { %2144 = vmatmul.msk.bf16.gmra.mxu2 %vm865_vm2, %v2211_v5  ;;  %2157 = vmatmul.msk.bf16.gmra.mxu3 %vm865_vm2, %v2224_v6 }
  0xd8   : > { %2119 = vmatmul.msk.bf16.gmra.mxu0 %vm865_vm2, %v2186_v7  ;;  %2132 = vmatmul.msk.bf16.gmra.mxu1 %vm865_vm2, %v2199_v8 }
  0xd9   : > { %2145 = vmatmul.msk.bf16.gmra.mxu2 %vm865_vm2, %v2212_v9  ;;  %2158 = vmatmul.msk.bf16.gmra.mxu3 %vm865_vm2, %v2225_v10 }
  0xe8   : > { %2120 = vmatmul.msk.bf16.gmra.mxu0 %vm865_vm2, %v2187_v11  ;;  %2133 = vmatmul.msk.bf16.gmra.mxu1 %vm865_vm2, %v2200_v12 }
  0xe9   : > { %2146 = vmatmul.msk.bf16.gmra.mxu2 %vm865_vm2, %v2213_v13  ;;  %2159 = vmatmul.msk.bf16.gmra.mxu3 %vm865_vm2, %v2226_v14  ;;  %v2191_v13 = vld [vmem:[%s2877_s23 + $0x58] sm:$0xff]  ;;  %v2204_v14 = vld [vmem:[%s2877_s23 + $0xc0] sm:$0xff] }
  0xf5   : > { %v1038_v17 = vpop.f32.mrf.mxu0  ;;  %v1103_v18 = vpop.f32.mrf.mxu1 }
  0xf6   : > { %v1298_v25 = vmax.f32 %v1038_v17, %v1103_v18 }
  0xf8   : > { %2121 = vmatmul.msk.bf16.gmra.mxu0 %vm865_vm2, %v2188_v15  ;;  %2134 = vmatmul.msk.bf16.gmra.mxu1 %vm865_vm2, %v2201_v16 }
  0xf9   : > { %2147 = vmatmul.msk.bf16.gmra.mxu2 %vm865_vm2, %v2214_v19  ;;  %2160 = vmatmul.msk.bf16.gmra.mxu3 %vm865_vm2, %v2227_v20  ;;  %v2217_v19 = vld [vmem:[%s2877_s23 + $0x128] sm:$0xff]  ;;  %v2230_v20 = vld [vmem:[%s2877_s23 + $0x190] sm:$0xff] }
  0xfc   : > { %v1168_v21 = vpop.f32.mrf.mxu2  ;;  %v1233_v22 = vpop.f32.mrf.mxu3 }
  0xfd   : > { %v1040_v23 = vpop.f32.mrf.mxu0  ;;  %v1105_v24 = vpop.f32.mrf.mxu1  ;;  %v1324_v26 = vmax.f32 %v1168_v21, %v1233_v22 }
  0xfe   : > { %v1299_v33 = vmax.f32 %v1040_v23, %v1105_v24 }
  0xff   : > { %v1350_v27 = vmax.f32 %v1298_v25, %v1324_v26 }
 0x101   : > { %v1380_v39 = vadd.f32 %v2954_v28, %v1350_v27 }
 0x103   : > { %v1406_v42 = vmax.f32 %v1380_v39, 0.0 }
 0x104   : > { %v1170_v29 = vpop.f32.mrf.mxu2  ;;  %v1235_v30 = vpop.f32.mrf.mxu3 }
 0x105   : > { %v1325_v34 = vmax.f32 %v1170_v29, %v1235_v30  ;;  %v1043_v35 = vpop.f32.mrf.mxu0  ;;  %v1108_v36 = vpop.f32.mrf.mxu1 }
 0x106   : > { %v1300_v49 = vmax.f32 %v1043_v35, %v1108_v36 }
 0x107   : > { %v1351_v40 = vmax.f32 %v1299_v33, %v1325_v34 }
 0x108   : > { %2122 = vmatmul.msk.bf16.gmra.mxu0 %vm865_vm2, %v2189_v31  ;;  %2135 = vmatmul.msk.bf16.gmra.mxu1 %vm865_vm2, %v2202_v32 }
 0x109   : > { %v1381_v41 = vadd.f32 %v2954_v28, %v1351_v40  ;;  %2148 = vmatmul.msk.bf16.gmra.mxu2 %vm865_vm2, %v2215_v37  ;;  %2161 = vmatmul.msk.bf16.gmra.mxu3 %vm865_vm2, %v2228_v38  ;;  %v2192_v37 = vld [vmem:[%s2877_s23 + $0x60] sm:$0xff]  ;;  %v2205_v38 = vld [vmem:[%s2877_s23 + $0xc8] sm:$0xff] }
 0x10b   : > { %v1407_v43 = vmax.f32 %v1381_v41, 0.0 }
 0x10c   : > { %v1173_v44 = vpop.f32.mrf.mxu2  ;;  %v1238_v45 = vpop.f32.mrf.mxu3 }
 0x10d   : > { %v2241_v46 = vpack.c.bf16 %v1407_v43, %v1406_v42  ;;  %v1045_v47 = vpop.f32.mrf.mxu0  ;;  %v1110_v48 = vpop.f32.mrf.mxu1  ;;  %v1326_v50 = vmax.f32 %v1173_v44, %v1238_v45  ;;  %v2218_v43 = vld [vmem:[%s2877_s23 + $0x130] sm:$0xff]  ;;  %v2231_v44 = vld [vmem:[%s2877_s23 + $0x198] sm:$0xff] }
 0x10e   : > { %v1301_v56 = vmax.f32 %v1045_v47, %v1110_v48 }
 0x10f   : > { %2242 = vst [vmem:[%s2968_s12] sm:$0xff] %v2241_v46   ;;  %v1352_v51 = vmax.f32 %v1300_v49, %v1326_v50 }
 0x111   : > { %v1382_v62 = vadd.f32 %v2954_v28, %v1352_v51 }
 0x113   : > { %v1408_v1 = vmax.f32 %v1382_v62, 0.0 }
 0x114   : > { %v1175_v52 = vpop.f32.mrf.mxu2  ;;  %v1240_v53 = vpop.f32.mrf.mxu3 }
 0x115   : > { %v1327_v57 = vmax.f32 %v1175_v52, %v1240_v53  ;;  %v1048_v58 = vpop.f32.mrf.mxu0  ;;  %v1113_v59 = vpop.f32.mrf.mxu1 }
 0x116   : > { %v1302_v8 = vmax.f32 %v1048_v58, %v1113_v59 }
 0x117   : > { %v1353_v63 = vmax.f32 %v1301_v56, %v1327_v57 }
 0x118   : > { %2123 = vmatmul.msk.bf16.gmra.mxu0 %vm865_vm2, %v2190_v54  ;;  %2136 = vmatmul.msk.bf16.gmra.mxu1 %vm865_vm2, %v2203_v55 }
 0x119   : > { %v1383_v0 = vadd.f32 %v2954_v28, %v1353_v63  ;;  %2149 = vmatmul.msk.bf16.gmra.mxu2 %vm865_vm2, %v2216_v60  ;;  %2162 = vmatmul.msk.bf16.gmra.mxu3 %vm865_vm2, %v2229_v61 }
 0x11b   : > { %v1409_v2 = vmax.f32 %v1383_v0, 0.0 }
 0x11c   : > { %v1178_v3 = vpop.f32.mrf.mxu2  ;;  %v1243_v4 = vpop.f32.mrf.mxu3 }
 0x11d   : > { %v2246_v5 = vpack.c.bf16 %v1409_v2, %v1408_v1  ;;  %v1050_v6 = vpop.f32.mrf.mxu0  ;;  %v1115_v7 = vpop.f32.mrf.mxu1  ;;  %v1328_v9 = vmax.f32 %v1178_v3, %v1243_v4 }
 0x11e   : > { %v1303_v15 = vmax.f32 %v1050_v6, %v1115_v7 }
 0x11f   : > { %2303 = vst [vmem:[%s2968_s12 + $0x8] sm:$0xff] %v2246_v5   ;;  %v1354_v10 = vmax.f32 %v1302_v8, %v1328_v9 }
 0x121   : > { %v1384_v21 = vadd.f32 %v2954_v28, %v1354_v10 }
 0x123   : > { %v1410_v24 = vmax.f32 %v1384_v21, 0.0 }
 0x124   : > { %v1180_v11 = vpop.f32.mrf.mxu2  ;;  %v1245_v12 = vpop.f32.mrf.mxu3 }
 0x125   : > { %v1329_v16 = vmax.f32 %v1180_v11, %v1245_v12  ;;  %v1053_v17 = vpop.f32.mrf.mxu0  ;;  %v1118_v18 = vpop.f32.mrf.mxu1 }
 0x126   : > { %v1304_v32 = vmax.f32 %v1053_v17, %v1118_v18 }
 0x127   : > { %v1355_v22 = vmax.f32 %v1303_v15, %v1329_v16 }
 0x128   : > { %2124 = vmatmul.msk.bf16.gmra.mxu0 %vm865_vm2, %v2191_v13  ;;  %2137 = vmatmul.msk.bf16.gmra.mxu1 %vm865_vm2, %v2204_v14 }
 0x129   : > { %v1385_v23 = vadd.f32 %v2954_v28, %v1355_v22  ;;  %2150 = vmatmul.msk.bf16.gmra.mxu2 %vm865_vm2, %v2217_v19  ;;  %2163 = vmatmul.msk.bf16.gmra.mxu3 %vm865_vm2, %v2230_v20 }
 0x12b   : > { %v1411_v25 = vmax.f32 %v1385_v23, 0.0 }
 0x12c   : > { %v1183_v26 = vpop.f32.mrf.mxu2  ;;  %v1248_v27 = vpop.f32.mrf.mxu3 }
 0x12d   : > { %v2251_v29 = vpack.c.bf16 %v1411_v25, %v1410_v24  ;;  %v1055_v30 = vpop.f32.mrf.mxu0  ;;  %v1120_v31 = vpop.f32.mrf.mxu1  ;;  %v1330_v33 = vmax.f32 %v1183_v26, %v1248_v27 }
 0x12e   : > { %v1305_v39 = vmax.f32 %v1055_v30, %v1120_v31 }
 0x12f   : > { %2304 = vst [vmem:[%s2968_s12 + $0x10] sm:$0xff] %v2251_v29   ;;  %v1356_v34 = vmax.f32 %v1304_v32, %v1330_v33 }
 0x131   : > { %v1386_v45 = vadd.f32 %v2954_v28, %v1356_v34 }
 0x133   : > { %v1412_v48 = vmax.f32 %v1386_v45, 0.0 }
 0x134   : > { %v1185_v35 = vpop.f32.mrf.mxu2  ;;  %v1250_v36 = vpop.f32.mrf.mxu3 }
 0x135   : > { %v1331_v40 = vmax.f32 %v1185_v35, %v1250_v36  ;;  %v1058_v41 = vpop.f32.mrf.mxu0  ;;  %v1123_v42 = vpop.f32.mrf.mxu1 }
 0x136   : > { %v1306_v55 = vmax.f32 %v1058_v41, %v1123_v42 }
 0x137   : > { %v1357_v46 = vmax.f32 %v1305_v39, %v1331_v40 }
 0x138   : > { %2125 = vmatmul.msk.bf16.gmra.mxu0 %vm865_vm2, %v2192_v37  ;;  %2138 = vmatmul.msk.bf16.gmra.mxu1 %vm865_vm2, %v2205_v38 }
 0x139   : > { %v1387_v47 = vadd.f32 %v2954_v28, %v1357_v46  ;;  %2151 = vmatmul.msk.bf16.gmra.mxu2 %vm865_vm2, %v2218_v43  ;;  %2164 = vmatmul.msk.bf16.gmra.mxu3 %vm865_vm2, %v2231_v44 }
 0x13b   : > { %v1413_v49 = vmax.f32 %v1387_v47, 0.0 }
 0x13c   : > { %v1188_v50 = vpop.f32.mrf.mxu2  ;;  %v1253_v51 = vpop.f32.mrf.mxu3 }
 0x13d   : > { %v2256_v52 = vpack.c.bf16 %v1413_v49, %v1412_v48  ;;  %v1060_v53 = vpop.f32.mrf.mxu0  ;;  %v1125_v54 = vpop.f32.mrf.mxu1  ;;  %v1332_v56 = vmax.f32 %v1188_v50, %v1253_v51 }
 0x13e   : > { %v1307_v60 = vmax.f32 %v1060_v53, %v1125_v54 }
 0x13f   : > { %2305 = vst [vmem:[%s2968_s12 + $0x18] sm:$0xff] %v2256_v52   ;;  %v1358_v57 = vmax.f32 %v1306_v55, %v1332_v56 }
 0x141   : > { %v1388_v0 = vadd.f32 %v2954_v28, %v1358_v57 }
 0x143   : > { %v1414_v3 = vmax.f32 %v1388_v0, 0.0 }
 0x144   : > { %v1190_v58 = vpop.f32.mrf.mxu2  ;;  %v1255_v59 = vpop.f32.mrf.mxu3 }
 0x145   : > { %v1333_v61 = vmax.f32 %v1190_v58, %v1255_v59  ;;  %v1063_v62 = vpop.f32.mrf.mxu0  ;;  %v1128_v63 = vpop.f32.mrf.mxu1 }
 0x146   : > { %v1308_v10 = vmax.f32 %v1063_v62, %v1128_v63 }
 0x147   : > { %v1359_v1 = vmax.f32 %v1307_v60, %v1333_v61 }
 0x149   : > { %v1389_v2 = vadd.f32 %v2954_v28, %v1359_v1 }
 0x14b   : > { %v1415_v4 = vmax.f32 %v1389_v2, 0.0 }
 0x14c   : > { %v1193_v5 = vpop.f32.mrf.mxu2  ;;  %v1258_v6 = vpop.f32.mrf.mxu3 }
 0x14d   : > { %v2261_v7 = vpack.c.bf16 %v1415_v4, %v1414_v3  ;;  %v1065_v8 = vpop.f32.mrf.mxu0  ;;  %v1130_v9 = vpop.f32.mrf.mxu1  ;;  %v1334_v11 = vmax.f32 %v1193_v5, %v1258_v6 }
 0x14e   : > { %v1309_v15 = vmax.f32 %v1065_v8, %v1130_v9 }
 0x14f   : > { %2306 = vst [vmem:[%s2968_s12 + $0x20] sm:$0xff] %v2261_v7   ;;  %v1360_v12 = vmax.f32 %v1308_v10, %v1334_v11 }
 0x151   : > { %v1390_v19 = vadd.f32 %v2954_v28, %v1360_v12 }
 0x153   : > { %v1416_v22 = vmax.f32 %v1390_v19, 0.0 }
 0x154   : > { %v1195_v13 = vpop.f32.mrf.mxu2  ;;  %v1260_v14 = vpop.f32.mrf.mxu3 }
 0x155   : > { %v1335_v16 = vmax.f32 %v1195_v13, %v1260_v14  ;;  %v1068_v17 = vpop.f32.mrf.mxu0  ;;  %v1133_v18 = vpop.f32.mrf.mxu1 }
 0x156   : > { %v1310_v30 = vmax.f32 %v1068_v17, %v1133_v18 }
 0x157   : > { %v1361_v20 = vmax.f32 %v1309_v15, %v1335_v16 }
 0x159   : > { %v1391_v21 = vadd.f32 %v2954_v28, %v1361_v20 }
 0x15b   : > { %v1417_v23 = vmax.f32 %v1391_v21, 0.0 }
 0x15c   : > { %v1198_v24 = vpop.f32.mrf.mxu2  ;;  %v1263_v25 = vpop.f32.mrf.mxu3 }
 0x15d   : > { %v2266_v26 = vpack.c.bf16 %v1417_v23, %v1416_v22  ;;  %v1070_v27 = vpop.f32.mrf.mxu0  ;;  %v1135_v29 = vpop.f32.mrf.mxu1  ;;  %v1336_v31 = vmax.f32 %v1198_v24, %v1263_v25 }
 0x15e   : > { %v1311_v35 = vmax.f32 %v1070_v27, %v1135_v29 }
 0x15f   : > { %2307 = vst [vmem:[%s2968_s12 + $0x28] sm:$0xff] %v2266_v26   ;;  %v1362_v32 = vmax.f32 %v1310_v30, %v1336_v31 }
 0x161   : > { %v1392_v39 = vadd.f32 %v2954_v28, %v1362_v32 }
 0x163   : > { %v1418_v42 = vmax.f32 %v1392_v39, 0.0 }
 0x164   : > { %v1200_v33 = vpop.f32.mrf.mxu2  ;;  %v1265_v34 = vpop.f32.mrf.mxu3 }
 0x165   : > { %v1337_v36 = vmax.f32 %v1200_v33, %v1265_v34  ;;  %v1073_v37 = vpop.f32.mrf.mxu0  ;;  %v1138_v38 = vpop.f32.mrf.mxu1 }
 0x166   : > { %v1312_v49 = vmax.f32 %v1073_v37, %v1138_v38 }
 0x167   : > { %v1363_v40 = vmax.f32 %v1311_v35, %v1337_v36 }
 0x169   : > { %v1393_v41 = vadd.f32 %v2954_v28, %v1363_v40 }
 0x16b   : > { %v1419_v43 = vmax.f32 %v1393_v41, 0.0 }
 0x16c   : > { %v1203_v44 = vpop.f32.mrf.mxu2  ;;  %v1268_v45 = vpop.f32.mrf.mxu3 }
 0x16d   : > { %v2271_v46 = vpack.c.bf16 %v1419_v43, %v1418_v42  ;;  %v1075_v47 = vpop.f32.mrf.mxu0  ;;  %v1140_v48 = vpop.f32.mrf.mxu1  ;;  %v1338_v50 = vmax.f32 %v1203_v44, %v1268_v45 }
 0x16e   : > { %v1313_v54 = vmax.f32 %v1075_v47, %v1140_v48 }
 0x16f   : > { %2308 = vst [vmem:[%s2968_s12 + $0x30] sm:$0xff] %v2271_v46   ;;  %v1364_v51 = vmax.f32 %v1312_v49, %v1338_v50 }
 0x171   : > { %v1394_v58 = vadd.f32 %v2954_v28, %v1364_v51 }
 0x173   : > { %v1420_v61 = vmax.f32 %v1394_v58, 0.0 }
 0x174   : > { %v1205_v52 = vpop.f32.mrf.mxu2  ;;  %v1270_v53 = vpop.f32.mrf.mxu3 }
 0x175   : > { %v1339_v55 = vmax.f32 %v1205_v52, %v1270_v53  ;;  %v1078_v56 = vpop.f32.mrf.mxu0  ;;  %v1143_v57 = vpop.f32.mrf.mxu1 }
 0x176   : > { %v1314_v4 = vmax.f32 %v1078_v56, %v1143_v57 }
 0x177   : > { %v1365_v59 = vmax.f32 %v1313_v54, %v1339_v55 }
 0x179   : > { %v1395_v60 = vadd.f32 %v2954_v28, %v1365_v59 }
 0x17b   : > { %v1421_v62 = vmax.f32 %v1395_v60, 0.0 }
 0x17c   : > { %v1208_v63 = vpop.f32.mrf.mxu2  ;;  %v1273_v0 = vpop.f32.mrf.mxu3 }
 0x17d   : > { %v2276_v1 = vpack.c.bf16 %v1421_v62, %v1420_v61  ;;  %v1080_v2 = vpop.f32.mrf.mxu0  ;;  %v1145_v3 = vpop.f32.mrf.mxu1  ;;  %v1340_v5 = vmax.f32 %v1208_v63, %v1273_v0 }
 0x17e   : > { %v1315_v9 = vmax.f32 %v1080_v2, %v1145_v3 }
 0x17f   : > { %2309 = vst [vmem:[%s2968_s12 + $0x38] sm:$0xff] %v2276_v1   ;;  %v1366_v6 = vmax.f32 %v1314_v4, %v1340_v5 }
 0x181   : > { %v1396_v13 = vadd.f32 %v2954_v28, %v1366_v6 }
 0x183   : > { %v1422_v16 = vmax.f32 %v1396_v13, 0.0 }
 0x184   : > { %v1210_v7 = vpop.f32.mrf.mxu2  ;;  %v1275_v8 = vpop.f32.mrf.mxu3 }
 0x185   : > { %v1341_v10 = vmax.f32 %v1210_v7, %v1275_v8  ;;  %v1083_v11 = vpop.f32.mrf.mxu0  ;;  %v1148_v12 = vpop.f32.mrf.mxu1 }
 0x186   : > { %v1316_v23 = vmax.f32 %v1083_v11, %v1148_v12 }
 0x187   : > { %v1367_v14 = vmax.f32 %v1315_v9, %v1341_v10 }
 0x189   : > { %v1397_v15 = vadd.f32 %v2954_v28, %v1367_v14 }
 0x18b   : > { %v1423_v17 = vmax.f32 %v1397_v15, 0.0 }
 0x18c   : > { %v1213_v18 = vpop.f32.mrf.mxu2  ;;  %v1278_v19 = vpop.f32.mrf.mxu3 }
 0x18d   : > { %v2281_v20 = vpack.c.bf16 %v1423_v17, %v1422_v16  ;;  %v1085_v21 = vpop.f32.mrf.mxu0  ;;  %v1150_v22 = vpop.f32.mrf.mxu1  ;;  %v1342_v24 = vmax.f32 %v1213_v18, %v1278_v19 }
 0x18e   : > { %v1317_v29 = vmax.f32 %v1085_v21, %v1150_v22 }
 0x18f   : > { %2310 = vst [vmem:[%s2968_s12 + $0x40] sm:$0xff] %v2281_v20   ;;  %v1368_v25 = vmax.f32 %v1316_v23, %v1342_v24 }
 0x191   : > { %v1398_v33 = vadd.f32 %v2954_v28, %v1368_v25 }
 0x193   : > { %v1424_v36 = vmax.f32 %v1398_v33, 0.0 }
 0x194   : > { %v1215_v26 = vpop.f32.mrf.mxu2  ;;  %v1280_v27 = vpop.f32.mrf.mxu3 }
 0x195   : > { %v1343_v30 = vmax.f32 %v1215_v26, %v1280_v27  ;;  %v1088_v31 = vpop.f32.mrf.mxu0  ;;  %v1153_v32 = vpop.f32.mrf.mxu1 }
 0x196   : > { %v1318_v43 = vmax.f32 %v1088_v31, %v1153_v32 }
 0x197   : > { %v1369_v34 = vmax.f32 %v1317_v29, %v1343_v30 }
 0x199   : > { %v1399_v35 = vadd.f32 %v2954_v28, %v1369_v34 }
 0x19b   : > { %v1425_v37 = vmax.f32 %v1399_v35, 0.0 }
 0x19c   : > { %v1218_v38 = vpop.f32.mrf.mxu2  ;;  %v1283_v39 = vpop.f32.mrf.mxu3 }
 0x19d   : > { %v2286_v40 = vpack.c.bf16 %v1425_v37, %v1424_v36  ;;  %v1090_v41 = vpop.f32.mrf.mxu0  ;;  %v1155_v42 = vpop.f32.mrf.mxu1  ;;  %v1344_v44 = vmax.f32 %v1218_v38, %v1283_v39 }
 0x19e   : > { %v1319_v48 = vmax.f32 %v1090_v41, %v1155_v42 }
 0x19f   : > { %2311 = vst [vmem:[%s2968_s12 + $0x48] sm:$0xff] %v2286_v40   ;;  %v1370_v45 = vmax.f32 %v1318_v43, %v1344_v44 }
 0x1a1   : > { %v1400_v52 = vadd.f32 %v2954_v28, %v1370_v45 }
 0x1a3   : > { %v1426_v55 = vmax.f32 %v1400_v52, 0.0 }
 0x1a4   : > { %v1220_v46 = vpop.f32.mrf.mxu2  ;;  %v1285_v47 = vpop.f32.mrf.mxu3 }
 0x1a5   : > { %v1345_v49 = vmax.f32 %v1220_v46, %v1285_v47  ;;  %v1093_v50 = vpop.f32.mrf.mxu0  ;;  %v1158_v51 = vpop.f32.mrf.mxu1 }
 0x1a6   : > { %v1320_v62 = vmax.f32 %v1093_v50, %v1158_v51 }
 0x1a7   : > { %v1371_v53 = vmax.f32 %v1319_v48, %v1345_v49 }
 0x1a9   : > { %v1401_v54 = vadd.f32 %v2954_v28, %v1371_v53 }
 0x1ab   : > { %v1427_v56 = vmax.f32 %v1401_v54, 0.0 }
 0x1ac   : > { %v1223_v57 = vpop.f32.mrf.mxu2  ;;  %v1288_v58 = vpop.f32.mrf.mxu3 }
 0x1ad   : > { %v2291_v59 = vpack.c.bf16 %v1427_v56, %v1426_v55  ;;  %v1095_v60 = vpop.f32.mrf.mxu0  ;;  %v1160_v61 = vpop.f32.mrf.mxu1  ;;  %v1346_v63 = vmax.f32 %v1223_v57, %v1288_v58 }
 0x1ae   : > { %v1321_v3 = vmax.f32 %v1095_v60, %v1160_v61 }
 0x1af   : > { %2312 = vst [vmem:[%s2968_s12 + $0x50] sm:$0xff] %v2291_v59   ;;  %v1372_v0 = vmax.f32 %v1320_v62, %v1346_v63 }
 0x1b1   : > { %v1402_v5 = vadd.f32 %v2954_v28, %v1372_v0 }
 0x1b3   : > { %v1428_v10 = vmax.f32 %v1402_v5, 0.0 }
 0x1b4   : > { %v1225_v1 = vpop.f32.mrf.mxu2  ;;  %v1290_v2 = vpop.f32.mrf.mxu3 }
 0x1b5   : > { %v1347_v4 = vmax.f32 %v1225_v1, %v1290_v2  ;;  %v1098_v7 = vpop.f32.mrf.mxu0  ;;  %v1163_v8 = vpop.f32.mrf.mxu1 }
 0x1b6   : > { %v1322_v15 = vmax.f32 %v1098_v7, %v1163_v8 }
 0x1b7   : > { %v1373_v6 = vmax.f32 %v1321_v3, %v1347_v4 }
 0x1b9   : > { %v1403_v9 = vadd.f32 %v2954_v28, %v1373_v6 }
 0x1bb   : > { %v1429_v11 = vmax.f32 %v1403_v9, 0.0 }
 0x1bc   : > { %v1228_v12 = vpop.f32.mrf.mxu2  ;;  %v1293_v13 = vpop.f32.mrf.mxu3 }
 0x1bd   : > { %v2296_v14 = vpack.c.bf16 %v1429_v11, %v1428_v10  ;;  %v1348_v16 = vmax.f32 %v1228_v12, %v1293_v13  ;;  %v1100_v17 = vpop.f32.mrf.mxu0  ;;  %v1165_v18 = vpop.f32.mrf.mxu1 }
 0x1be   : > { %v1323_v22 = vmax.f32 %v1100_v17, %v1165_v18 }
 0x1bf   : > { %2313 = vst [vmem:[%s2968_s12 + $0x58] sm:$0xff] %v2296_v14   ;;  %v1374_v19 = vmax.f32 %v1322_v15, %v1348_v16 }
 0x1c1   : > { %v1404_v24 = vadd.f32 %v2954_v28, %v1374_v19 }
 0x1c3   : > { %v1430_v27 = vmax.f32 %v1404_v24, 0.0 }
 0x1c4   : > { %v1230_v20 = vpop.f32.mrf.mxu2  ;;  %v1295_v21 = vpop.f32.mrf.mxu3 }
 0x1c5   : > { %v1349_v23 = vmax.f32 %v1230_v20, %v1295_v21 }
 0x1c7   : > { %v1375_v25 = vmax.f32 %v1323_v22, %v1349_v23 }
 0x1c9   : > { %v1405_v26 = vadd.f32 %v2954_v28, %v1375_v25 }
 0x1cb   : > { %v1431_v29 = vmax.f32 %v1405_v26, 0.0  ;;  %1490 = sbr.rel (!%p2698_p5) target bundleno = 537 (0x219), region = 98 }
 0x1cd   : > { %v2301_v30 = vpack.c.bf16 %v1431_v29, %v1430_v27 }
 0x1cf   : > { %2314 = vst [vmem:[%s2968_s12 + $0x60] sm:$0xff] %v2301_v30  }
 0x1d0   : > { %s3184_s28 = smov (!%p1493_p4, %s1492_s28), 26 }
 0x1d1   : > { %s2165_s6 = sshll.u32 %s3184_s28, 2 }
 0x1d2   : > { %p2168_p6 = scmp.eq.s32.totalorder %s2165_s6, 0 }
 0x1d3   : > { %2488 = sdivrem.u32 (!%p2168_p6), %s3184_s28, 26 }
 0x1d4   : > { %1501 = sbr.rel (%p2168_p6) target bundleno = 537 (0x219), region = 102 }
 0x1dc   : > { %s3044_s20 = spop.drf %2488 }
 0x1dd   : > { %s2490_s14 = spop.drf %2488  ;;  %p2169_p5 = scmp.le.s32.totalorder %s3044_s20, 0 }
 0x1de   : > { %s3169_s15 = smov (!%p2169_p5), %s3038_s5  ;;  %s3170_s7 = smov (!%p2169_p5), %s2968_s12 }
 0x1df   : > { %1824 = sbr.rel (%p2169_p5) target bundleno = 511 (0x1ff), region = 215  ;;  %s3053_s8 = smov (!%p2169_p5), 0  }
 0x1e0   : > { %s3055_s9 = smov (!%p2169_p5), 0  }
 0x1e4 LB: >> { %v1519_v28 = vld [vmem:[%s2620_s7] sm:$0xf]  ;;  %v1521_v31 = vld [vmem:[%s2620_s7 + $0x4] sm:$0xf]  ;;  %v1523_v32 = vld [vmem:[%s2620_s7 + $0x8] sm:$0xf]  ;;  %s2628_s9 = sphi %s3055_s9, %s1513_s9   ;;  %s2624_s8 = sphi %s3053_s8, %s3173_s8   ;;  %s2620_s7 = sphi %s3170_s7, %s3172_s7   ;;  %s2616_s15 = sphi %s3169_s15, %s3171_s15  }
 0x1e5   : >> { %1520 = vst [vmem:[%s2616_s15] sm:$0xf] %v1519_v28  ;;  %v1525_v33 = vld [vmem:[%s2620_s7 + $0xc] sm:$0xf]  ;;  %v1527_v34 = vld [vmem:[%s2620_s7 + $0x10] sm:$0xf]  ;;  %s1571_s10 = sadd.s32 1, %s2624_s8 }
 0x1e6   : >> { %1522 = vst [vmem:[%s2616_s15 + $0x4] sm:$0xf] %v1521_v31  ;;  %v1529_v35 = vld [vmem:[%s2620_s7 + $0x14] sm:$0xf]  ;;  %v1531_v36 = vld [vmem:[%s2620_s7 + $0x18] sm:$0xf]  ;;  %p1572_p7 = scmp.ge.s32.totalorder %s1571_s10, %s3044_s20 }
 0x1e7   : >> { %1524 = vst [vmem:[%s2616_s15 + $0x8] sm:$0xf] %v1523_v32  ;;  %v1533_v37 = vld [vmem:[%s2620_s7 + $0x1c] sm:$0xf]  ;;  %v1535_v38 = vld [vmem:[%s2620_s7 + $0x20] sm:$0xf] }
 0x1e8   : >> { %1526 = vst [vmem:[%s2616_s15 + $0xc] sm:$0xf] %v1525_v33  ;;  %v1537_v39 = vld [vmem:[%s2620_s7 + $0x24] sm:$0xf]  ;;  %v1539_v40 = vld [vmem:[%s2620_s7 + $0x28] sm:$0xf] }
 0x1e9   : >> { %1528 = vst [vmem:[%s2616_s15 + $0x10] sm:$0xf] %v1527_v34  ;;  %v1541_v41 = vld [vmem:[%s2620_s7 + $0x2c] sm:$0xf]  ;;  %v1543_v42 = vld [vmem:[%s2620_s7 + $0x30] sm:$0xf] }
 0x1ea   : >> { %1530 = vst [vmem:[%s2616_s15 + $0x14] sm:$0xf] %v1529_v35  ;;  %v1545_v43 = vld [vmem:[%s2620_s7 + $0x34] sm:$0xf]  ;;  %v1547_v44 = vld [vmem:[%s2620_s7 + $0x38] sm:$0xf] }
 0x1eb   : >> { %1532 = vst [vmem:[%s2616_s15 + $0x18] sm:$0xf] %v1531_v36  ;;  %s3186_s10 = smov (%p1572_p7, %s1571_s10), 0  ;;  %v1549_v45 = vld [vmem:[%s2620_s7 + $0x3c] sm:$0xf]  ;;  %s1513_s9 = sadd.s32 1, %s2628_s9  }
 0x1ec   : >> { %1534 = vst [vmem:[%s2616_s15 + $0x1c] sm:$0xf] %v1533_v37  ;;  %v1551_v46 = vld [vmem:[%s2620_s7 + $0x40] sm:$0xf]  ;;  %s1574_s11 = smul.u32 104, %s3186_s10  ;;  %p1512_p8 = scmp.ge.s32.totalorder %s1513_s9, %s3044_s20 }
 0x1ed   : >> { %1536 = vst [vmem:[%s2616_s15 + $0x20] sm:$0xf] %v1535_v38  ;;  %v1553_v47 = vld [vmem:[%s2620_s7 + $0x44] sm:$0xf]  ;;  %v1555_v48 = vld [vmem:[%s2620_s7 + $0x48] sm:$0xf]  ;;  %s3173_s8 = smov %s3186_s10 }
 0x1ee   : >> { %1538 = vst [vmem:[%s2616_s15 + $0x24] sm:$0xf] %v1537_v39  ;;  %s1576_s17 = scalar_lea.vmem %s2968_s12, %s1574_s11 [#allocation3]   ;;  %s1577_s18 = scalar_lea.vmem %s3038_s5, %s1574_s11   ;;  %v1557_v49 = vld [vmem:[%s2620_s7 + $0x4c] sm:$0xf]  ;;  %v1559_v50 = vld [vmem:[%s2620_s7 + $0x50] sm:$0xf] }
 0x1ef   : >> { %1540 = vst [vmem:[%s2616_s15 + $0x28] sm:$0xf] %v1539_v40  ;;  %v1561_v51 = vld [vmem:[%s2620_s7 + $0x54] sm:$0xf]  ;;  %v1563_v52 = vld [vmem:[%s2620_s7 + $0x58] sm:$0xf] }
 0x1f0   : >> { %1542 = vst [vmem:[%s2616_s15 + $0x2c] sm:$0xf] %v1541_v41  ;;  %v1565_v53 = vld [vmem:[%s2620_s7 + $0x5c] sm:$0xf]  ;;  %v1567_v54 = vld [vmem:[%s2620_s7 + $0x60] sm:$0xf] }
 0x1f1   : >> { %1544 = vst [vmem:[%s2616_s15 + $0x30] sm:$0xf] %v1543_v42  ;;  %v1569_v55 = vld [vmem:[%s2620_s7 + $0x64] sm:$0xf]  ;;  %s3172_s7 = smov %s1576_s17 }
 0x1f2   : >> { %1546 = vst [vmem:[%s2616_s15 + $0x34] sm:$0xf] %v1545_v43 }
 0x1f3   : >> { %1548 = vst [vmem:[%s2616_s15 + $0x38] sm:$0xf] %v1547_v44 }
 0x1f4   : >> { %1550 = vst [vmem:[%s2616_s15 + $0x3c] sm:$0xf] %v1549_v45 }
 0x1f5   : >> { %1552 = vst [vmem:[%s2616_s15 + $0x40] sm:$0xf] %v1551_v46 }
 0x1f6   : >> { %1554 = vst [vmem:[%s2616_s15 + $0x44] sm:$0xf] %v1553_v47 }
 0x1f7   : >> { %1556 = vst [vmem:[%s2616_s15 + $0x48] sm:$0xf] %v1555_v48 }
 0x1f8   : >> { %1558 = vst [vmem:[%s2616_s15 + $0x4c] sm:$0xf] %v1557_v49 }
 0x1f9   : >> { %1560 = vst [vmem:[%s2616_s15 + $0x50] sm:$0xf] %v1559_v50 }
 0x1fa   : >> { %1562 = vst [vmem:[%s2616_s15 + $0x54] sm:$0xf] %v1561_v51  ;;  %1515 = sbr.rel (!%p1512_p8) target bundleno = 484 (0x1e4), region = 221 }
 0x1fb   : >> { %1564 = vst [vmem:[%s2616_s15 + $0x58] sm:$0xf] %v1563_v52 }
 0x1fc   : >> { %1566 = vst [vmem:[%s2616_s15 + $0x5c] sm:$0xf] %v1565_v53 }
 0x1fd   : >> { %1568 = vst [vmem:[%s2616_s15 + $0x60] sm:$0xf] %v1567_v54 }
 0x1fe   : >> { %1570 = vst [vmem:[%s2616_s15 + $0x64] sm:$0xf] %v1569_v55  ;;  %s3171_s15 = smov %s1577_s18 }
 0x1ff PF: > { %2491 = sdivrem.u32 %s3184_s28, 26 }
 0x200   : > { %s2170_s21 = smul.u32 104, %s3044_s20 }
 0x202   : > { %s3142_s22 = scalar_lea.vmem %s2968_s12, %s2170_s21 [#allocation3]   ;;  %s1584_s23 = scalar_lea.vmem %s3038_s5, %s2170_s21  }
 0x208   : > { %s2492_s25 = spop.drf %2491 }
 0x209   : > { %s2493_s26 = spop.drf %2491 }
 0x20a   : > { %p2172_p9 = scmp.le.s32.totalorder %s2493_s26, 0 }
 0x20b   : > { %s2630_s27 = smov (!%p2172_p9), %s1584_s23   ;;  %s2634_s29 = smov (!%p2172_p9), %s3142_s22  }
 0x20c   : > { %1838 = sbr.rel (%p2172_p9) target bundleno = 537 (0x219), region = 226  ;;  %s2638_s24 = smov (!%p2172_p9), 0  }
 0x20d   : > { %s2642_s30 = smov (!%p2172_p9), 0  }
 0x211 LB: >> { %v1594_v56 = vld [vmem:[%s2636_s29] sm:$0xf]  ;;  %s1596_s12 = sadd.s32 1, %s2640_s24  ;;  %s1588_s30 = sadd.s32 1, %s2644_s30   ;;  %s2644_s30 = sphi %s2642_s30, %s1588_s30   ;;  %s2640_s24 = sphi %s2638_s24, %s2639_s24   ;;  %s2636_s29 = sphi %s2634_s29, %s1601_s29   ;;  %s2632_s27 = sphi %s2630_s27, %s1602_s27  }
 0x212   : >> { %1595 = vst [vmem:[%s2632_s27] sm:$0xf] %v1594_v56  ;;  %p1597_p10 = scmp.ge.s32.totalorder %s1596_s12, %s2493_s26  ;;  %p1587_p11 = scmp.ge.s32.totalorder %s1588_s30, %s2493_s26 }
 0x214   : >> { %s3188_s12 = smov (%p1597_p10, %s1596_s12), 0  ;;  %1590 = sbr.rel (!%p1587_p11) target bundleno = 529 (0x211), region = 232 }
 0x215   : >> { %s2173_s28 = sshll.u32 %s3188_s12, 2  ;;  %s2639_s24 = smov %s3188_s12  }
 0x216   : >> { %s1601_s29 = scalar_lea.vmem %s3142_s22, %s2173_s28 [#allocation3]   ;;  %s1602_s27 = scalar_lea.vmem %s1584_s23, %s2173_s28  }
 0x219 PF: > { %p10_p12 = scmp.ge.s32.totalorder %s2686_s16, 4   ;;  %s3174_s12 = smov %s2576_s13 }
 0x21a   : > { %s3175_s13 = smov %s2696_s19  ;;  %s3176_s14 = smov %s2686_s16 }
 0x21b   :  { %12 = sbr.rel (!%p10_p12) target bundleno = 2 (0x2), region = 243 }

// kernel: net_forward.4
= control target key start
LH: loop header
LB: loop body
LE: loop exit
PB: predicated region body
PF: predicated region fallthrough
CT: control target
= control target key end

     0   :  { %s1493_s12 = smov 0   ;;  %s1495_s13 = smov 0   ;;  %s1784_s0 = inlined_call_operand.vmem [shape: bf16[4,50,150], index: 0, kind: input, shape index: {}]   ;;  %s1785_s1 = inlined_call_operand.vmem [shape: bf16[150,128], index: 1, kind: input, shape index: {}]   ;;  %s1786_s2 = inlined_call_operand.vmem [shape: f32[1,128], index: 2, kind: input, shape index: {}]   ;;  %s1787_s3 = inlined_call_operand.vmem [shape: bf16[50,128], index: 3, kind: output, shape index: {}]  }
   0x1   :  { %s1497_s14 = smov 0  }
   0x2 LB: > { %s1509_s15 = sadd.s32 4294967295, %s1407_s14   ;;  %s1512_s16 = sadd.s32 1, %s1407_s14   ;;  %s1407_s14 = sphi %s1497_s14, %s1801_s14   ;;  %s1403_s13 = sphi %s1495_s13, %s1800_s13   ;;  %s1399_s12 = sphi %s1493_s12, %s1799_s12  }
   0x3   : > { %s17_s17 = ssub.s32 %s1407_s14, %s1512_s16  ;;  %s20_s18 = sadd.s32 1, %s1403_s13 }
   0x4   : > { %p18_p0 = scmp.eq.s32.totalorder %s17_s17, 0  ;;  %p27_p1 = scmp.ne.s32.totalorder %s1403_s13, %s1399_s12 }
   0x5   : > { %p28_p2 = scmp.eq.s32.totalorder %s1407_s14, 0  ;;  %p99_p3 = scmp.eq.s32.totalorder %s1509_s15, 1 }
   0x6   : > { %s1522_s19 = scalar_select %p18_p0, %s1403_s13, %s20_s18  }
   0x7   : > { %p29_p4 = por %p28_p2, %p27_p1  ;;  %p1524_p5 = por %p99_p3, %p27_p1 }
   0x8   : > { %p968_p6 = scmp.ge.s32.totalorder %s1407_s14, 2 }
   0xa   : > { %127 = sbr.rel (%p968_p6) target bundleno = 68 (0x44), region = 24 }
   0xf   : > { %130 = sbr.rel (!%p29_p4) target bundleno = 68 (0x44), region = 28  ;;  %s132_s21 = sand.u32 (%p29_p4), 1, %s1403_s13  }
  0x10   : > { %s970_s22 = sshll.u32 (%p29_p4), %s1407_s14, 2  ;;  %s969_s23 = sshll.u32 (%p29_p4), %s132_s21, 7 }
  0x11   : > { %s136_s24 = ssub.s32 (%p29_p4), 7, %s970_s22  ;;  %s1116_s25 = sshll.u32 (%p29_p4), %s1407_s14, 5 }
  0x12   : > { %p137_p7 = scmp.lt.s32.totalorder (%p29_p4), %s136_s24, 4  ;;  %s1537_s28 = scalar_lea.vmem (%p29_p4), %s1784_s0, %s1116_s25  }
  0x13   : > { %s1540_s30 = scalar_lea.vmem (%p29_p4), [#allocation2], %s969_s23  }
  0x14   : > { %s1803_s24 = smov (!%p137_p7, %s136_s24), 4 }
  0x15   : > { %s1114_s29 = sshll.u32 %s1803_s24, 5 }
  0x16   : > { %p976_p8 = scmp.eq.s32.totalorder %s1114_s29, 0 }
  0x17   : > { %s1543_s4 = sshrl.u32 (!%p976_p8), %s1803_s24, 2 }
  0x18   : > { %147 = sbr.rel (%p976_p8) target bundleno = 68 (0x44), region = 32  ;;  %p977_p9 = scmp.le.s32.totalorder (!%p976_p8), %s1543_s4, 0 }
  0x1d   : > { %894 = sbr.rel (%p977_p9) target bundleno = 51 (0x33), region = 177  ;;  %s1789_s5 = smov (!%p977_p9), %s1540_s30 }
  0x1e   : > { %s1790_s6 = smov (!%p977_p9), %s1537_s28  ;;  %s1552_s7 = smov (!%p977_p9), 0  }
  0x1f   : > { %s1554_s8 = smov (!%p977_p9), 0  }
  0x22 LB: >> { %v246_v0 = vld [vmem:[%s1415_s6] sm:$0xff]  ;;  %v248_v1 = vld [vmem:[%s1415_s6 + $0x8] sm:$0xff]  ;;  %v250_v2 = vld [vmem:[%s1415_s6 + $0x10] sm:$0xff]  ;;  %s278_s9 = sadd.s32 1, %s1419_s7  ;;  %s240_s8 = sadd.s32 1, %s1423_s8   ;;  %s1423_s8 = sphi %s1554_s8, %s240_s8   ;;  %s1419_s7 = sphi %s1552_s7, %s1793_s7   ;;  %s1415_s6 = sphi %s1790_s6, %s1792_s6   ;;  %s1411_s5 = sphi %s1789_s5, %s1791_s5  }
  0x23   : >> { %247 = vst [vmem:[%s1411_s5] sm:$0xff] %v246_v0  ;;  %v252_v3 = vld [vmem:[%s1415_s6 + $0x18] sm:$0xff]  ;;  %p279_p10 = scmp.ge.s32.totalorder %s278_s9, %s1543_s4  ;;  %v256_v5 = vld [vmem:[%s1415_s6 + $0x40] sm:$0xff]  ;;  %v258_v6 = vld [vmem:[%s1415_s6 + $0x48] sm:$0xff]  ;;  %p239_p11 = scmp.ge.s32.totalorder %s240_s8, %s1543_s4 }
  0x24   : >> { %249 = vst [vmem:[%s1411_s5 + $0x8] sm:$0xff] %v248_v1  ;;  %v254_v4 = vld [vmem:[%s1415_s6 + $0x38] sm:$0xff]  ;;  %v260_v7 = vld [vmem:[%s1415_s6 + $0x50] sm:$0xff]  ;;  %v266_v10 = vld [vmem:[%s1415_s6 + $0x80] sm:$0xff] }
  0x25   : >> { %251 = vst [vmem:[%s1411_s5 + $0x10] sm:$0xff] %v250_v2  ;;  %s1805_s9 = smov (%p279_p10, %s278_s9), 0  ;;  %v262_v8 = vld [vmem:[%s1415_s6 + $0x70] sm:$0xff]  ;;  %v264_v9 = vld [vmem:[%s1415_s6 + $0x78] sm:$0xff]  ;;  %v268_v11 = vld [vmem:[%s1415_s6 + $0x88] sm:$0xff] }
  0x26   : >> { %253 = vst [vmem:[%s1411_s5 + $0x18] sm:$0xff] %v252_v3  ;;  %s978_s10 = sshll.u32 %s1805_s9, 5  ;;  %v270_v12 = vld [vmem:[%s1415_s6 + $0xa8] sm:$0xff]  ;;  %v272_v13 = vld [vmem:[%s1415_s6 + $0xb0] sm:$0xff]  ;;  %v274_v14 = vld [vmem:[%s1415_s6 + $0xb8] sm:$0xff]  ;;  %s1793_s7 = smov %s1805_s9 }
  0x27   : >> { %255 = vst [vmem:[%s1411_s5 + $0x20] sm:$0xff] %v254_v4  ;;  %s283_s11 = scalar_lea.vmem %s1537_s28, %s978_s10   ;;  %s284_s17 = scalar_lea.vmem %s1540_s30, %s978_s10 [#allocation2]   ;;  %v276_v15 = vld [vmem:[%s1415_s6 + $0xc0] sm:$0xff] }
  0x28   : >> { %257 = vst [vmem:[%s1411_s5 + $0x28] sm:$0xff] %v256_v5  ;;  %s1792_s6 = smov %s283_s11 }
  0x29   : >> { %259 = vst [vmem:[%s1411_s5 + $0x30] sm:$0xff] %v258_v6 }
  0x2a   : >> { %261 = vst [vmem:[%s1411_s5 + $0x38] sm:$0xff] %v260_v7 }
  0x2b   : >> { %263 = vst [vmem:[%s1411_s5 + $0x40] sm:$0xff] %v262_v8 }
  0x2c   : >> { %265 = vst [vmem:[%s1411_s5 + $0x48] sm:$0xff] %v264_v9 }
  0x2d   : >> { %267 = vst [vmem:[%s1411_s5 + $0x50] sm:$0xff] %v266_v10 }
  0x2e   : >> { %269 = vst [vmem:[%s1411_s5 + $0x58] sm:$0xff] %v268_v11  ;;  %242 = sbr.rel (!%p239_p11) target bundleno = 34 (0x22), region = 183 }
  0x2f   : >> { %271 = vst [vmem:[%s1411_s5 + $0x60] sm:$0xff] %v270_v12 }
  0x30   : >> { %273 = vst [vmem:[%s1411_s5 + $0x68] sm:$0xff] %v272_v13 }
  0x31   : >> { %275 = vst [vmem:[%s1411_s5 + $0x70] sm:$0xff] %v274_v14 }
  0x32   : >> { %277 = vst [vmem:[%s1411_s5 + $0x78] sm:$0xff] %v276_v15  ;;  %s1791_s5 = smov %s284_s17 }
  0x33 PF: > { %s1616_s18 = sand.u32 3, %s1803_s24   ;;  %s1117_s21 = sshll.u32 %s1543_s4, 5 }
  0x34   : > { %s1620_s22 = scalar_lea.vmem %s1537_s28, %s1117_s21   ;;  %s1623_s23 = scalar_lea.vmem %s1540_s30, %s1117_s21 [#allocation2]  }
  0x35   : > { %p983_p12 = scmp.le.s32.totalorder %s1616_s18, 0 }
  0x36   : > { %s1794_s25 = smov (!%p983_p12), %s1623_s23  ;;  %s1795_s26 = smov (!%p983_p12), %s1620_s22 }
  0x37   : > { %908 = sbr.rel (%p983_p12) target bundleno = 68 (0x44), region = 188  ;;  %s1433_s27 = smov (!%p983_p12), 0  }
  0x38   : > { %s1437_s29 = smov (!%p983_p12), 0  }
  0x3c LB: >> { %v301_v16 = vld [vmem:[%s1431_s26] sm:$0xff]  ;;  %v303_v17 = vld [vmem:[%s1431_s26 + $0x38] sm:$0xff]  ;;  %v305_v18 = vld [vmem:[%s1431_s26 + $0x70] sm:$0xff]  ;;  %s309_s24 = sadd.s32 1, %s1435_s27  ;;  %s295_s29 = sadd.s32 1, %s1439_s29   ;;  %s1439_s29 = sphi %s1437_s29, %s295_s29   ;;  %s1435_s27 = sphi %s1433_s27, %s1434_s27   ;;  %s1431_s26 = sphi %s1795_s26, %s314_s26   ;;  %s1427_s25 = sphi %s1794_s25, %s315_s25  }
  0x3d   : >> { %302 = vst [vmem:[%s1427_s25] sm:$0xff] %v301_v16  ;;  %v307_v19 = vld [vmem:[%s1431_s26 + $0xa8] sm:$0xff]  ;;  %p310_p13 = scmp.ge.s32.totalorder %s309_s24, %s1616_s18  ;;  %p294_p0 = scmp.ge.s32.totalorder %s295_s29, %s1616_s18 }
  0x3e   : >> { %304 = vst [vmem:[%s1427_s25 + $0x20] sm:$0xff] %v303_v17 }
  0x3f   : >> { %306 = vst [vmem:[%s1427_s25 + $0x40] sm:$0xff] %v305_v18  ;;  %s1807_s24 = smov (%p310_p13, %s309_s24), 0  ;;  %297 = sbr.rel (!%p294_p0) target bundleno = 60 (0x3c), region = 194 }
  0x40   : >> { %308 = vst [vmem:[%s1427_s25 + $0x60] sm:$0xff] %v307_v19  ;;  %s984_s28 = sshll.u32 %s1807_s24, 3  ;;  %s1434_s27 = smov %s1807_s24  }
  0x41   : >> { %s314_s26 = scalar_lea.vmem %s1620_s22, %s984_s28   ;;  %s315_s25 = scalar_lea.vmem %s1623_s23, %s984_s28 [#allocation2]  }
  0x44 PF: > { %p986_p1 = scmp.ge.s32.totalorder %s1407_s14, 1  ;;  %p320_p2 = scmp.lt.s32.totalorder %s1407_s14, 3 }
  0x46   : > { %p321_p3 = pnand %p986_p1, %p320_p2 }
  0x47   : > { %s327_s7 = sand.u32 (!%p321_p3), 1, %s1399_s12  }
  0x48   : > { %324 = sbr.rel (%p321_p3) target bundleno = 351 (0x15f), region = 80  ;;  %s987_s8 = sshll.u32 (!%p321_p3), %s327_s7, 7 }
  0x49   : > { %s1662_s21 = scalar_lea.vmem (!%p321_p3), [#allocation2], %s987_s8  ;;  %s988_s8 = sshll.u32 (!%p321_p3), %s327_s7, 4 }
  0x4a   : > { %s1724_s14 = scalar_lea.vmem (!%p321_p3), [#allocation3], %s988_s8  }
  0x4d   : > { %v1142_v20 = vld [vmem:[%s1785_s1 + $0x38] sm:$0xff]  ;;  %v395_v21 = vld [vmem:[%s1785_s1 + $0x48] sm:$0x7]  ;;  %vm550_vm0 = vcmask 1042432   ;;  %v1141_v23 = vld [vmem:[%s1785_s1 + $0x30] sm:$0xff]  ;;  %vm525_vm1 = vcmask 179200  }
  0x4e   : > { %v505_v22 = vunpack.c.l.b16 %v395_v21  ;;  %554 = vmatpush.bf16.msra.mxu0 %v1142_v20  ;;  %1158 = vmatpush.bf16.msra.mxu2 %v1142_v20  ;;  %v1143_v26 = vld [vmem:[%s1785_s1 + $0x40] sm:$0xff]  ;;  %v1140_v27 = vld [vmem:[%s1785_s1 + $0x28] sm:$0xff]  ;;  %v1129_v30 = vld [vmem:[%s1662_s21 + $0x54] sm:$0xf]  ;;  %s1098_s12 = sshll.u32 (%p1524_p5), %s1509_s15, 2  ;;  %s1144_s7 = sshll.u32 (%p1524_p5), %s1509_s15, 4 }
  0x4f   : > { %v1119_v28 = vld [vmem:[%s1662_s21 + $0x4] sm:$0xf]  ;;  %v993_v29 = vld [vmem:[%s1662_s21 + $0x8] sm:$0xf0]  ;;  %v1033_v31 = vld [vmem:[%s1662_s21 + $0x58] sm:$0xf0]  ;;  %s1735_s17 = scalar_lea.vmem (%p1524_p5), %s1787_s3, %s1144_s7  }
  0x50   : > { %v515_v24 = vpack.c.b16 %v505_v22, %v505_v22  ;;  %v996_v32 = vor.u32 %v1119_v28, %v993_v29  ;;  %v1139_v33 = vld [vmem:[%s1785_s1 + $0x20] sm:$0xff]  ;;  %v1036_v34 = vor.u32 %v1129_v30, %v1033_v31  ;;  %v1138_v35 = vld [vmem:[%s1785_s1 + $0x18] sm:$0xff]  ;;  %v1137_v36 = vld [vmem:[%s1785_s1 + $0x10] sm:$0xff]  ;;  %s692_s9 = ssub.s32 (%p1524_p5), 7, %s1098_s12 }
  0x51   : > { %v1136_v37 = vld [vmem:[%s1785_s1 + $0x8] sm:$0xff]  ;;  %v1121_v38 = vld [vmem:[%s1662_s21 + $0x14] sm:$0xf]  ;;  %v1001_v39 = vld [vmem:[%s1662_s21 + $0x18] sm:$0xf0]  ;;  %p693_p4 = scmp.lt.s32.totalorder (%p1524_p5), %s692_s9, 4 }
  0x52   : > { %v552_v25 = vsel %vm550_vm0, %v515_v24, 0  ;;  %555 = vmatpush.bf16.msra.mxu0 %v1141_v23  ;;  %1159 = vmatpush.bf16.msra.mxu2 %v1141_v23  ;;  %v1131_v40 = vld [vmem:[%s1662_s21 + $0x64] sm:$0xf]  ;;  %v1041_v41 = vld [vmem:[%s1662_s21 + $0x68] sm:$0xf0]  ;;  %v1004_v42 = vor.u32 %v1121_v38, %v1001_v39 }
  0x53   : > { %609 = vmatpush.bf16.msra.mxu1 %v552_v25  ;;  %1166 = vmatpush.bf16.msra.mxu3 %v552_v25  ;;  %v1135_v43 = vld [vmem:[%s1785_s1] sm:$0xff]  ;;  %v1120_v45 = vld [vmem:[%s1662_s21 + $0x4] sm:$0xf0]  ;;  %v1044_v46 = vor.u32 %v1131_v40, %v1041_v41  ;;  %v1009_v52 = vld [vmem:[%s1662_s21 + $0x28] sm:$0xf0] }
  0x54   : > { %v991_v44 = vld [vmem:[%s1662_s21] sm:$0xf]  ;;  %v1128_v48 = vld [vmem:[%s1662_s21 + $0x44] sm:$0xf0]  ;;  %v1123_v51 = vld [vmem:[%s1662_s21 + $0x24] sm:$0xf] }
  0x55   : > { %v1023_v47 = vld [vmem:[%s1662_s21 + $0x40] sm:$0xf]  ;;  %v992_v49 = vor.u32 %v1120_v45, %v991_v44  ;;  %v1133_v53 = vld [vmem:[%s1662_s21 + $0x74] sm:$0xf]  ;;  %v1049_v54 = vld [vmem:[%s1662_s21 + $0x78] sm:$0xf0]  ;;  %v1012_v55 = vor.u32 %v1123_v51, %v1009_v52 }
  0x56   : > { %556 = vmatpush.bf16.msra.mxu0 %v1140_v27  ;;  %1160 = vmatpush.bf16.msra.mxu2 %v1140_v27  ;;  %v1024_v50 = vor.u32 %v1128_v48, %v1023_v47  ;;  %v999_v56 = vld [vmem:[%s1662_s21 + $0x10] sm:$0xf]  ;;  %v1122_v57 = vld [vmem:[%s1662_s21 + $0x14] sm:$0xf0]  ;;  %v1052_v58 = vor.u32 %v1133_v53, %v1049_v54  ;;  %v1125_v63 = vld [vmem:[%s1662_s21 + $0x34] sm:$0xf] }
  0x57   : > { %610 = vmatpush.bf16.msra.mxu1 %v1143_v26  ;;  %1167 = vmatpush.bf16.msra.mxu3 %v1143_v26  ;;  %v1031_v59 = vld [vmem:[%s1662_s21 + $0x50] sm:$0xf]  ;;  %v1130_v60 = vld [vmem:[%s1662_s21 + $0x54] sm:$0xf0]  ;;  %v1000_v61 = vor.u32 %v1122_v57, %v999_v56  ;;  %v1017_v0 = vld [vmem:[%s1662_s21 + $0x38] sm:$0xf0] }
  0x58   : > { %v1032_v62 = vor.u32 %v1130_v60, %v1031_v59  ;;  %v1020_v1 = vor.u32 %v1125_v63, %v1017_v0  ;;  %v1007_v2 = vld [vmem:[%s1662_s21 + $0x20] sm:$0xf]  ;;  %v1124_v3 = vld [vmem:[%s1662_s21 + $0x24] sm:$0xf0]  ;;  %v1127_v8 = vld [vmem:[%s1662_s21 + $0x44] sm:$0xf] }
  0x59   : > { %v1039_v4 = vld [vmem:[%s1662_s21 + $0x60] sm:$0xf]  ;;  %v1132_v5 = vld [vmem:[%s1662_s21 + $0x64] sm:$0xf0]  ;;  %v1008_v6 = vor.u32 %v1124_v3, %v1007_v2  ;;  %v1025_v9 = vld [vmem:[%s1662_s21 + $0x48] sm:$0xf0] }
  0x5a   : > { %1089 = vmatmul.msk.bf16.vlgmr.msra.gmra.mxu1 %vm525_vm1, %v996_v32  ;;  %557 = vmatpush.bf16.msra.mxu0 %v1139_v33  ;;  %v1040_v7 = vor.u32 %v1132_v5, %v1039_v4  ;;  %v1028_v10 = vor.u32 %v1127_v8, %v1025_v9  ;;  %v1015_v11 = vld [vmem:[%s1662_s21 + $0x30] sm:$0xf]  ;;  %v1126_v12 = vld [vmem:[%s1662_s21 + $0x34] sm:$0xf0]  ;;  %v1320_v53 = vld [vmem:[%s1786_s2] ss:$0 sm:$0xff] }
  0x5b   : > { %1094 = vmatmul.msk.bf16.vlgmr.msra.gmra.mxu3 %vm525_vm1, %v1036_v34  ;;  %1161 = vmatpush.bf16.msra.mxu2 %v1139_v33  ;;  %v1047_v13 = vld [vmem:[%s1662_s21 + $0x70] sm:$0xf]  ;;  %v1134_v14 = vld [vmem:[%s1662_s21 + $0x74] sm:$0xf0]  ;;  %v1016_v15 = vor.u32 %v1126_v12, %v1015_v11 }
  0x5c   : > { %v1048_v16 = vor.u32 %v1134_v14, %v1047_v13 }
  0x5e   : > { %558 = vmatpush.bf16.msra.mxu0 %v1138_v35 }
  0x5f   : > { %1162 = vmatpush.bf16.msra.mxu2 %v1138_v35 }
  0x62   : > { %559 = vmatpush.bf16.msra.mxu0 %v1137_v36 }
  0x63   : > { %1163 = vmatpush.bf16.msra.mxu2 %v1137_v36 }
  0x66   : > { %560 = vmatpush.bf16.msra.mxu0 %v1136_v37 }
  0x67   : > { %1164 = vmatpush.bf16.msra.mxu2 %v1136_v37 }
  0x6a   : > { %1090 = vmatmul.msk.bf16.gmra.mxu1 %vm525_vm1, %v1004_v42  ;;  %561 = vmatpush.bf16.msra.mxu0 %v1135_v43 }
  0x6b   : > { %1095 = vmatmul.msk.bf16.gmra.mxu3 %vm525_vm1, %v1044_v46  ;;  %1165 = vmatpush.bf16.msra.mxu2 %v1135_v43 }
  0x6d   : > { %562 = vmatmul.bf16.vlgmr.msra.gmra.mxu0 %v992_v49 }
  0x6e   : > { %582 = vmatmul.bf16.vlgmr.msra.gmra.mxu2 %v1024_v50 }
  0x7a   : > { %1091 = vmatmul.msk.bf16.gmra.mxu1 %vm525_vm1, %v1012_v55 }
  0x7b   : > { %1096 = vmatmul.msk.bf16.gmra.mxu3 %vm525_vm1, %v1052_v58 }
  0x7d   : > { %567 = vmatmul.bf16.gmra.mxu0 %v1000_v61 }
  0x7e   : > { %587 = vmatmul.bf16.gmra.mxu2 %v1032_v62 }
  0x8a   : > { %1092 = vmatmul.msk.bf16.gmra.mxu1 %vm525_vm1, %v1020_v1 }
  0x8d   : > { %572 = vmatmul.bf16.gmra.mxu0 %v1008_v6 }
  0x8e   : > { %592 = vmatmul.bf16.gmra.mxu2 %v1040_v7 }
  0x9a   : > { %1093 = vmatmul.msk.bf16.gmra.mxu1 %vm525_vm1, %v1028_v10 }
  0x9d   : > { %577 = vmatmul.bf16.gmra.mxu0 %v1016_v15 }
  0x9e   : > { %597 = vmatmul.bf16.gmra.mxu2 %v1048_v16 }
  0xd7   : > { %v612_v17 = vpop.f32.mrf.mxu1 }
  0xde   : > { %v637_v25 = vpop.f32.mrf.mxu3 }
  0xdf   : > { %v614_v18 = vpop.f32.mrf.mxu1 }
  0xe6   : > { %v639_v30 = vpop.f32.mrf.mxu3 }
  0xe7   : > { %v617_v19 = vpop.f32.mrf.mxu1 }
  0xea   : > { %v563_v20 = vpop.f32.mrf.mxu0 }
  0xeb   : > { %v613_v45 = vadd.f32 %v612_v17, %v563_v20 }
  0xee   : > { %v642_v35 = vpop.f32.mrf.mxu3 }
  0xef   : > { %v619_v21 = vpop.f32.mrf.mxu1 }
  0xf1   : > { %v583_v22 = vpop.f32.mrf.mxu2 }
  0xf2   : > { %v565_v23 = vpop.f32.mrf.mxu0 }
  0xf3   : > { %v615_v51 = vadd.f32 %v614_v18, %v565_v23 }
  0xf6   : > { %v644_v39 = vpop.f32.mrf.mxu3 }
  0xf7   : > { %v622_v24 = vpop.f32.mrf.mxu1 }
  0xf9   : > { %v585_v26 = vpop.f32.mrf.mxu2 }
  0xfa   : > { %v568_v27 = vpop.f32.mrf.mxu0 }
  0xfb   : > { %v618_v3 = vadd.f32 %v617_v19, %v568_v27 }
  0xfe   : > { %v647_v55 = vpop.f32.mrf.mxu3 }
  0xff   : > { %v624_v28 = vpop.f32.mrf.mxu1 }
 0x101   : > { %v588_v29 = vpop.f32.mrf.mxu2 }
 0x102   : > { %v570_v31 = vpop.f32.mrf.mxu0  ;;  %v638_v63 = vadd.f32 %v637_v25, %v588_v29 }
 0x103   : > { %v620_v12 = vadd.f32 %v619_v21, %v570_v31 }
 0x106   : > { %v649_v10 = vpop.f32.mrf.mxu3 }
 0x107   : > { %v627_v32 = vpop.f32.mrf.mxu1 }
 0x109   : > { %v590_v33 = vpop.f32.mrf.mxu2 }
 0x10a   : > { %v573_v34 = vpop.f32.mrf.mxu0  ;;  %v640_v13 = vadd.f32 %v639_v30, %v590_v33 }
 0x10b   : > { %v623_v42 = vadd.f32 %v622_v24, %v573_v34 }
 0x10d   : > { %v652_v48 = vmax.f32 %v613_v45, %v623_v42 }
 0x10f   : > { %v629_v36 = vpop.f32.mrf.mxu1 }
 0x111   : > { %v593_v37 = vpop.f32.mrf.mxu2 }
 0x112   : > { %v575_v38 = vpop.f32.mrf.mxu0  ;;  %v643_v43 = vadd.f32 %v642_v35, %v593_v37 }
 0x113   : > { %v625_v49 = vadd.f32 %v624_v28, %v575_v38 }
 0x115   : > { %v653_v57 = vmax.f32 %v615_v51, %v625_v49 }
 0x117   : > { %v632_v40 = vpop.f32.mrf.mxu1 }
 0x118   : > { %v633_v41 = vadd.f32 %v632_v40, %v583_v22 }
 0x119   : > { %v595_v44 = vpop.f32.mrf.mxu2 }
 0x11a   : > { %v656_v46 = vmax.f32 %v633_v41, %v643_v43  ;;  %v578_v47 = vpop.f32.mrf.mxu0  ;;  %v645_v54 = vadd.f32 %v644_v39, %v595_v44 }
 0x11b   : > { %v628_v0 = vadd.f32 %v627_v32, %v578_v47 }
 0x11c   : > { %v660_v52 = vmax.f32 %v652_v48, %v656_v46 }
 0x11d   : > { %v654_v7 = vmax.f32 %v618_v3, %v628_v0 }
 0x11e   : > { %v668_v61 = vadd.f32 %v1320_v53, %v660_v52 }
 0x11f   : > { %v634_v50 = vpop.f32.mrf.mxu1 }
 0x120   : > { %v635_v56 = vadd.f32 %v634_v50, %v585_v26  ;;  %v672_v5 = vmax.f32 %v668_v61, 0.0 }
 0x121   : > { %v598_v59 = vpop.f32.mrf.mxu2 }
 0x122   : > { %v657_v58 = vmax.f32 %v635_v56, %v645_v54  ;;  %v648_v60 = vadd.f32 %v647_v55, %v598_v59  ;;  %v580_v2 = vpop.f32.mrf.mxu0 }
 0x123   : > { %v630_v8 = vadd.f32 %v629_v36, %v580_v2 }
 0x124   : > { %v661_v62 = vmax.f32 %v653_v57, %v657_v58  ;;  %v658_v4 = vmax.f32 %v638_v63, %v648_v60 }
 0x125   : > { %v655_v16 = vmax.f32 %v620_v12, %v630_v8 }
 0x126   : > { %v669_v1 = vadd.f32 %v1320_v53, %v661_v62  ;;  %v662_v14 = vmax.f32 %v654_v7, %v658_v4 }
 0x128   : > { %v673_v6 = vmax.f32 %v669_v1, 0.0  ;;  %v670_v18 = vadd.f32 %v1320_v53, %v662_v14 }
 0x129   : > { %v600_v11 = vpop.f32.mrf.mxu2 }
 0x12a   : > { %v1150_v9 = vpack.c.bf16 %v673_v6, %v672_v5  ;;  %v650_v15 = vadd.f32 %v649_v10, %v600_v11  ;;  %v674_v22 = vmax.f32 %v670_v18, 0.0 }
 0x12c   : > { %1151 = vst [vmem:[%s1724_s14] sm:$0xff] %v1150_v9   ;;  %v659_v17 = vmax.f32 %v640_v13, %v650_v15 }
 0x12e   : > { %v663_v19 = vmax.f32 %v655_v16, %v659_v17 }
 0x130   : > { %v671_v20 = vadd.f32 %v1320_v53, %v663_v19 }
 0x132   : > { %v675_v23 = vmax.f32 %v671_v20, 0.0  ;;  %690 = sbr.rel (!%p1524_p5) target bundleno = 351 (0x15f), region = 88 }
 0x134   : > { %v1155_v24 = vpack.c.bf16 %v675_v23, %v674_v22 }
 0x136   : > { %1157 = vst [vmem:[%s1724_s14 + $0x8] sm:$0xff] %v1155_v24  }
 0x137   : > { %s1809_s9 = smov (!%p693_p4, %s692_s9), 4 }
 0x138   : > { %s1099_s18 = sshll.u32 %s1809_s9, 2 }
 0x139   : > { %p1102_p6 = scmp.eq.s32.totalorder %s1099_s18, 0 }
 0x13a   : > { %s1741_s20 = sshrl.u32 (!%p1102_p6), %s1809_s9, 2 }
 0x13b   : > { %701 = sbr.rel (%p1102_p6) target bundleno = 351 (0x15f), region = 92  ;;  %p1103_p5 = scmp.le.s32.totalorder (!%p1102_p6), %s1741_s20, 0 }
 0x140   : > { %922 = sbr.rel (%p1103_p5) target bundleno = 334 (0x14e), region = 199  ;;  %s1796_s15 = smov (!%p1103_p5), %s1735_s17 }
 0x141   : > { %s1797_s21 = smov (!%p1103_p5), %s1724_s14  ;;  %s1750_s22 = smov (!%p1103_p5), 0  }
 0x142   : > { %s1453_s23 = smov (!%p1103_p5), 0  }
 0x145 LB: >> { %v718_v21 = vld [vmem:[%s1447_s21] sm:$0xf]  ;;  %v720_v25 = vld [vmem:[%s1447_s21 + $0x4] sm:$0xf]  ;;  %v722_v26 = vld [vmem:[%s1447_s21 + $0x8] sm:$0xf]  ;;  %s1455_s23 = sphi %s1453_s23, %s712_s23   ;;  %s1451_s22 = sphi %s1750_s22, %s1798_s22   ;;  %s1447_s21 = sphi %s1797_s21, %s731_s21   ;;  %s1443_s15 = sphi %s1796_s15, %s732_s15  }
 0x146   : >> { %719 = vst [vmem:[%s1443_s15] sm:$0xf] %v718_v21  ;;  %v724_v27 = vld [vmem:[%s1447_s21 + $0xc] sm:$0xf]  ;;  %s726_s25 = sadd.s32 1, %s1451_s22  ;;  %s712_s23 = sadd.s32 1, %s1455_s23  }
 0x147   : >> { %721 = vst [vmem:[%s1443_s15 + $0x4] sm:$0xf] %v720_v25  ;;  %p727_p7 = scmp.ge.s32.totalorder %s726_s25, %s1741_s20  ;;  %p711_p8 = scmp.ge.s32.totalorder %s712_s23, %s1741_s20 }
 0x148   : >> { %723 = vst [vmem:[%s1443_s15 + $0x8] sm:$0xf] %v722_v26 }
 0x149   : >> { %725 = vst [vmem:[%s1443_s15 + $0xc] sm:$0xf] %v724_v27  ;;  %s1811_s25 = smov (%p727_p7, %s726_s25), 0  ;;  %714 = sbr.rel (!%p711_p8) target bundleno = 325 (0x145), region = 205 }
 0x14a   : >> { %s1104_s26 = sshll.u32 %s1811_s25, 4  ;;  %s1798_s22 = smov %s1811_s25 }
 0x14b   : >> { %s731_s21 = scalar_lea.vmem %s1724_s14, %s1104_s26 [#allocation3]   ;;  %s732_s15 = scalar_lea.vmem %s1735_s17, %s1104_s26  }
 0x14e PF: > { %s1766_s27 = sand.u32 3, %s1809_s9   ;;  %s1145_s29 = sshll.u32 %s1741_s20, 4 }
 0x14f   : > { %s737_s24 = scalar_lea.vmem %s1724_s14, %s1145_s29 [#allocation3]   ;;  %s739_s28 = scalar_lea.vmem %s1735_s17, %s1145_s29  }
 0x150   : > { %p1109_p9 = scmp.le.s32.totalorder %s1766_s27, 0 }
 0x151   : > { %s1457_s30 = smov (!%p1109_p9), %s739_s28   ;;  %s1461_s4 = smov (!%p1109_p9), %s737_s24  }
 0x152   : > { %936 = sbr.rel (%p1109_p9) target bundleno = 351 (0x15f), region = 210  ;;  %s1465_s5 = smov (!%p1109_p9), 0  }
 0x153   : > { %s1469_s6 = smov (!%p1109_p9), 0  }
 0x157 LB: >> { %v749_v28 = vld [vmem:[%s1463_s4] sm:$0xf]  ;;  %s751_s8 = sadd.s32 1, %s1467_s5  ;;  %s743_s6 = sadd.s32 1, %s1471_s6   ;;  %s1471_s6 = sphi %s1469_s6, %s743_s6   ;;  %s1467_s5 = sphi %s1465_s5, %s1466_s5   ;;  %s1463_s4 = sphi %s1461_s4, %s756_s4   ;;  %s1459_s30 = sphi %s1457_s30, %s757_s30  }
 0x158   : >> { %750 = vst [vmem:[%s1459_s30] sm:$0xf] %v749_v28  ;;  %p752_p10 = scmp.ge.s32.totalorder %s751_s8, %s1766_s27  ;;  %p742_p11 = scmp.ge.s32.totalorder %s743_s6, %s1766_s27 }
 0x15a   : >> { %s1813_s8 = smov (%p752_p10, %s751_s8), 0  ;;  %745 = sbr.rel (!%p742_p11) target bundleno = 343 (0x157), region = 216 }
 0x15b   : >> { %s1110_s14 = sshll.u32 %s1813_s8, 2  ;;  %s1466_s5 = smov %s1813_s8  }
 0x15c   : >> { %s756_s4 = scalar_lea.vmem %s737_s24, %s1110_s14 [#allocation3]   ;;  %s757_s30 = scalar_lea.vmem %s739_s28, %s1110_s14  }
 0x15f PF: > { %p10_p12 = scmp.ge.s32.totalorder %s1512_s16, 4   ;;  %s1799_s12 = smov %s1403_s13 }
 0x160   : > { %s1800_s13 = smov %s1522_s19  ;;  %s1801_s14 = smov %s1512_s16 }
 0x161   :  { %12 = sbr.rel (!%p10_p12) target bundleno = 2 (0x2), region = 227 }

// kernel: net_forward.5
= control target key start
LH: loop header
LB: loop body
LE: loop exit
PB: predicated region body
PF: predicated region fallthrough
CT: control target
= control target key end

     0   :  { %s4036_s0 = inlined_call_operand.vmem [shape: bf16[2,3200], index: 0, kind: input, shape index: {}]   ;;  %s4037_s1 = inlined_call_operand.vmem [shape: bf16[3200,128], index: 1, kind: input, shape index: {}]   ;;  %s4038_s2 = inlined_call_operand.vmem [shape: f32[1,128], index: 2, kind: input, shape index: {}]   ;;  %s4039_s3 = inlined_call_operand.vmem [shape: bf16[128,128], index: 3, kind: input, shape index: {}]   ;;  %s4040_s4 = inlined_call_operand.vmem [shape: f32[1,128], index: 4, kind: input, shape index: {}]   ;;  %s4041_s5 = inlined_call_operand.vmem [shape: bf16[128,128], index: 5, kind: input, shape index: {}]   ;;  %s4042_s6 = inlined_call_operand.vmem [shape: f32[1,128], index: 6, kind: input, shape index: {}]   ;;  %s4043_s7 = inlined_call_operand.hbm [shape: f32[2,128], index: 7, kind: output, shape index: {}]  }
   0x1   :  { %v3072_v0 = vld [vmem:[%s4037_s1 + $0x38] sm:$0xff]  ;;  %v3071_v4 = vld [vmem:[%s4037_s1 + $0x30] sm:$0xff]  ;;  %v3070_v8 = vld [vmem:[%s4037_s1 + $0x28] sm:$0xff] }
   0x2   :  { %v3088_v1 = vld [vmem:[%s4037_s1 + $0xb8] sm:$0xff]  ;;  %1693 = vmatpush.bf16.msra.mxu0 %v3072_v0  ;;  %v3087_v5 = vld [vmem:[%s4037_s1 + $0xb0] sm:$0xff]  ;;  %v3086_v9 = vld [vmem:[%s4037_s1 + $0xa8] sm:$0xff] }
   0x3   :  { %v3080_v2 = vld [vmem:[%s4037_s1 + $0x78] sm:$0xff]  ;;  %1719 = vmatpush.bf16.msra.mxu2 %v3088_v1  ;;  %v3079_v6 = vld [vmem:[%s4037_s1 + $0x70] sm:$0xff]  ;;  %v3078_v10 = vld [vmem:[%s4037_s1 + $0x68] sm:$0xff] }
   0x4   :  { %v3096_v3 = vld [vmem:[%s4037_s1 + $0xf8] sm:$0xff]  ;;  %1706 = vmatpush.bf16.msra.mxu1 %v3080_v2  ;;  %v3095_v7 = vld [vmem:[%s4037_s1 + $0xf0] sm:$0xff]  ;;  %v3094_v11 = vld [vmem:[%s4037_s1 + $0xe8] sm:$0xff] }
   0x5   :  { %1732 = vmatpush.bf16.msra.mxu3 %v3096_v3  ;;  %v3069_v12 = vld [vmem:[%s4037_s1 + $0x20] sm:$0xff]  ;;  %v3068_v16 = vld [vmem:[%s4037_s1 + $0x18] sm:$0xff]  ;;  %v3067_v21 = vld [vmem:[%s4037_s1 + $0x10] sm:$0xff] }
   0x6   :  { %1694 = vmatpush.bf16.msra.mxu0 %v3071_v4  ;;  %v3085_v13 = vld [vmem:[%s4037_s1 + $0xa0] sm:$0xff]  ;;  %v3084_v17 = vld [vmem:[%s4037_s1 + $0x98] sm:$0xff]  ;;  %v3083_v22 = vld [vmem:[%s4037_s1 + $0x90] sm:$0xff] }
   0x7   :  { %1720 = vmatpush.bf16.msra.mxu2 %v3087_v5  ;;  %v3077_v14 = vld [vmem:[%s4037_s1 + $0x60] sm:$0xff]  ;;  %v3076_v18 = vld [vmem:[%s4037_s1 + $0x58] sm:$0xff]  ;;  %v3075_v23 = vld [vmem:[%s4037_s1 + $0x50] sm:$0xff] }
   0x8   :  { %1707 = vmatpush.bf16.msra.mxu1 %v3079_v6  ;;  %v3093_v15 = vld [vmem:[%s4037_s1 + $0xe0] sm:$0xff]  ;;  %v3092_v19 = vld [vmem:[%s4037_s1 + $0xd8] sm:$0xff]  ;;  %v3091_v24 = vld [vmem:[%s4037_s1 + $0xd0] sm:$0xff] }
   0x9   :  { %1733 = vmatpush.bf16.msra.mxu3 %v3095_v7  ;;  %v27_v20 = vld [vmem:[%s4036_s0] sm:$0xff] }
   0xa   :  { %1695 = vmatpush.bf16.msra.mxu0 %v3070_v8  ;;  %436 = vst [vmem:[#allocation1] ss:$9 sm:$0xff] %v27_v20 }
   0xb   :  { %1721 = vmatpush.bf16.msra.mxu2 %v3086_v9 }
   0xc   :  { %1708 = vmatpush.bf16.msra.mxu1 %v3078_v10 }
   0xd   :  { %1734 = vmatpush.bf16.msra.mxu3 %v3094_v11 }
   0xe   :  { %1696 = vmatpush.bf16.msra.mxu0 %v3069_v12 }
   0xf   :  { %1722 = vmatpush.bf16.msra.mxu2 %v3085_v13 }
  0x10   :  { %1709 = vmatpush.bf16.msra.mxu1 %v3077_v14 }
  0x11   :  { %1735 = vmatpush.bf16.msra.mxu3 %v3093_v15 }
  0x12   :  { %1697 = vmatpush.bf16.msra.mxu0 %v3068_v16 }
  0x13   :  { %1723 = vmatpush.bf16.msra.mxu2 %v3084_v17 }
  0x14   :  { %1710 = vmatpush.bf16.msra.mxu1 %v3076_v18 }
  0x15   :  { %1736 = vmatpush.bf16.msra.mxu3 %v3092_v19 }
  0x16   :  { %12 = vsyncpa [#allocation3], 0  ;;  %1698 = vmatpush.bf16.msra.mxu0 %v3067_v21  ;;  %v3066_v25 = vld [vmem:[%s4037_s1 + $0x8] sm:$0xff]  ;;  %v3065_v29 = vld [vmem:[%s4037_s1] sm:$0xff]  ;;  %s3311_s23 = smov [#allocation2]  }
  0x17   :  { %1724 = vmatpush.bf16.msra.mxu2 %v3083_v22  ;;  %v3082_v26 = vld [vmem:[%s4037_s1 + $0x88] sm:$0xff]  ;;  %v3081_v30 = vld [vmem:[%s4037_s1 + $0x80] sm:$0xff]  ;;  %v3104_v31 = vld [vmem:[%s4037_s1 + $0x138] sm:$0xff]  ;;  %s2190_s24 = sshll.u32 %s3311_s23, 4  ;;  %s2191_s24 = int_to_ptr.vmem [resolvable:$true] %s2190_s24 }
  0x18   :  { %1711 = vmatpush.bf16.msra.mxu1 %v3075_v23  ;;  %v3074_v27 = vld [vmem:[%s4037_s1 + $0x48] sm:$0xff]  ;;  %v3120_v32 = vld [vmem:[%s4037_s1 + $0x1b8] sm:$0xff]  ;;  %v3073_v33 = vld [vmem:[%s4037_s1 + $0x40] sm:$0xff] }
  0x19   :  { %1737 = vmatpush.bf16.msra.mxu3 %v3091_v24  ;;  %v3090_v28 = vld [vmem:[%s4037_s1 + $0xc8] sm:$0xff]  ;;  %v3089_v34 = vld [vmem:[%s4037_s1 + $0xc0] sm:$0xff]  ;;  %v3112_v35 = vld [vmem:[%s4037_s1 + $0x178] sm:$0xff] }
  0x1a   :  { %1699 = vmatpush.bf16.msra.mxu0 %v3066_v25  ;;  %v3128_v36 = vld [vmem:[%s4037_s1 + $0x1f8] sm:$0xff]  ;;  %v3103_v37 = vld [vmem:[%s4037_s1 + $0x130] sm:$0xff]  ;;  %v437_v40 = vld [vmem:[#allocation1] sm:$0xff] }
  0x1b   :  { %1725 = vmatpush.bf16.msra.mxu2 %v3082_v26  ;;  %v3119_v38 = vld [vmem:[%s4037_s1 + $0x1b0] sm:$0xff]  ;;  %v440_v43 = vld [vmem:[#allocation1 + $0x1b] sm:$0xff]  ;;  %v3102_v45 = vld [vmem:[%s4037_s1 + $0x128] sm:$0xff] }
  0x1c   :  { %1712 = vmatpush.bf16.msra.mxu1 %v3074_v27  ;;  %v439_v39 = vld [vmem:[#allocation1 + $0x12] sm:$0xff]  ;;  %v438_v44 = vld [vmem:[#allocation1 + $0x9] sm:$0xff]  ;;  %v3485_v49 = vld [vmem:[#allocation1 + $0x3f] sm:$0xff] }
  0x1d   :  { %1738 = vmatpush.bf16.msra.mxu3 %v3090_v28  ;;  %v3111_v41 = vld [vmem:[%s4037_s1 + $0x170] sm:$0xff]  ;;  %v3118_v46 = vld [vmem:[%s4037_s1 + $0x1a8] sm:$0xff]  ;;  %v3101_v54 = vld [vmem:[%s4037_s1 + $0x120] sm:$0xff] }
  0x1e   :  { %1700 = vmatpush.bf16.msra.mxu0 %v3065_v29  ;;  %v3127_v42 = vld [vmem:[%s4037_s1 + $0x1f0] sm:$0xff]  ;;  %v3483_v48 = vld [vmem:[#allocation1 + $0x24] sm:$0xff]  ;;  %v3100_v58 = vld [vmem:[%s4037_s1 + $0x118] sm:$0xff] }
  0x1f   :  { %1726 = vmatpush.bf16.msra.mxu2 %v3081_v30  ;;  %v3481_v47 = vld [vmem:[#allocation1 + $0x36] sm:$0xff]  ;;  %v28_v50 = vld [vmem:[%s4036_s0 + $0x8] sm:$0xff]  ;;  %v3117_v55 = vld [vmem:[%s4037_s1 + $0x1a0] sm:$0xff] }
  0x20   :  { %1713 = vmatpush.bf16.msra.mxu1 %v3073_v33  ;;  %v3490_v51 = vld [vmem:[#allocation1 + $0x2d] sm:$0xff]  ;;  %v3109_v56 = vld [vmem:[%s4037_s1 + $0x160] sm:$0xff]  ;;  %v3116_v59 = vld [vmem:[%s4037_s1 + $0x198] sm:$0xff] }
  0x21   :  { %1739 = vmatpush.bf16.msra.mxu3 %v3089_v34  ;;  %1701 = vmatmul.bf16.vlgmr.msra.gmra.mxu0 %v437_v40  ;;  %v3110_v52 = vld [vmem:[%s4037_s1 + $0x168] sm:$0xff]  ;;  %446 = vst [vmem:[#allocation1] ss:$9 sm:$0xff] %v28_v50  ;;  %v3125_v57 = vld [vmem:[%s4037_s1 + $0x1e0] sm:$0xff]  ;;  %v3108_v60 = vld [vmem:[%s4037_s1 + $0x158] sm:$0xff] }
  0x22   :  { %1745 = vmatpush.bf16.msrb.mxu0 %v3104_v31  ;;  %1727 = vmatmul.bf16.vlgmr.msra.gmra.mxu2 %v439_v39  ;;  %v3126_v53 = vld [vmem:[%s4037_s1 + $0x1e8] sm:$0xff]  ;;  %v3124_v61 = vld [vmem:[%s4037_s1 + $0x1d8] sm:$0xff]  ;;  %v3099_v62 = vld [vmem:[%s4037_s1 + $0x110] sm:$0xff] }
  0x23   :  { %1771 = vmatpush.bf16.msrb.mxu2 %v3120_v32  ;;  %1714 = vmatmul.bf16.vlgmr.msra.gmra.mxu1 %v438_v44  ;;  %v3115_v63 = vld [vmem:[%s4037_s1 + $0x190] sm:$0xff]  ;;  %v3098_v2 = vld [vmem:[%s4037_s1 + $0x108] sm:$0xff]  ;;  %v3097_v6 = vld [vmem:[%s4037_s1 + $0x100] sm:$0xff] }
  0x24   :  { %1758 = vmatpush.bf16.msrb.mxu1 %v3112_v35  ;;  %1740 = vmatmul.bf16.vlgmr.msra.gmra.mxu3 %v440_v43  ;;  %v3107_v0 = vld [vmem:[%s4037_s1 + $0x150] sm:$0xff]  ;;  %v3114_v3 = vld [vmem:[%s4037_s1 + $0x188] sm:$0xff]  ;;  %v3113_v7 = vld [vmem:[%s4037_s1 + $0x180] sm:$0xff] }
  0x25   :  { %1784 = vmatpush.bf16.msrb.mxu3 %v3128_v36  ;;  %v3123_v1 = vld [vmem:[%s4037_s1 + $0x1d0] sm:$0xff]  ;;  %v3106_v4 = vld [vmem:[%s4037_s1 + $0x148] sm:$0xff]  ;;  %v3136_v8 = vld [vmem:[%s4037_s1 + $0x238] sm:$0xff] }
  0x26   :  { %1746 = vmatpush.bf16.msrb.mxu0 %v3103_v37  ;;  %v3122_v5 = vld [vmem:[%s4037_s1 + $0x1c8] sm:$0xff]  ;;  %v3152_v9 = vld [vmem:[%s4037_s1 + $0x2b8] sm:$0xff]  ;;  %v3105_v10 = vld [vmem:[%s4037_s1 + $0x140] sm:$0xff] }
  0x27   :  { %1772 = vmatpush.bf16.msrb.mxu2 %v3119_v38  ;;  %v3121_v11 = vld [vmem:[%s4037_s1 + $0x1c0] sm:$0xff]  ;;  %v3144_v12 = vld [vmem:[%s4037_s1 + $0x278] sm:$0xff]  ;;  %v3135_v14 = vld [vmem:[%s4037_s1 + $0x230] sm:$0xff] }
  0x28   :  { %1759 = vmatpush.bf16.msrb.mxu1 %v3111_v41  ;;  %v3160_v13 = vld [vmem:[%s4037_s1 + $0x2f8] sm:$0xff]  ;;  %v3151_v15 = vld [vmem:[%s4037_s1 + $0x2b0] sm:$0xff]  ;;  %v3134_v18 = vld [vmem:[%s4037_s1 + $0x228] sm:$0xff] }
  0x29   :  { %1785 = vmatpush.bf16.msrb.mxu3 %v3127_v42  ;;  %v3143_v16 = vld [vmem:[%s4037_s1 + $0x270] sm:$0xff]  ;;  %v3150_v19 = vld [vmem:[%s4037_s1 + $0x2a8] sm:$0xff]  ;;  %v3133_v22 = vld [vmem:[%s4037_s1 + $0x220] sm:$0xff] }
  0x2a   :  { %1747 = vmatpush.bf16.msrb.mxu0 %v3102_v45  ;;  %v3159_v17 = vld [vmem:[%s4037_s1 + $0x2f0] sm:$0xff]  ;;  %v3142_v20 = vld [vmem:[%s4037_s1 + $0x268] sm:$0xff]  ;;  %v3149_v23 = vld [vmem:[%s4037_s1 + $0x2a0] sm:$0xff] }
  0x2b   :  { %1773 = vmatpush.bf16.msrb.mxu2 %v3118_v46  ;;  %v3158_v21 = vld [vmem:[%s4037_s1 + $0x2e8] sm:$0xff]  ;;  %v3141_v24 = vld [vmem:[%s4037_s1 + $0x260] sm:$0xff]  ;;  %v3132_v26 = vld [vmem:[%s4037_s1 + $0x218] sm:$0xff] }
  0x2c   :  { %1760 = vmatpush.bf16.msrb.mxu1 %v3110_v52  ;;  %v3157_v25 = vld [vmem:[%s4037_s1 + $0x2e0] sm:$0xff]  ;;  %v3148_v27 = vld [vmem:[%s4037_s1 + $0x298] sm:$0xff]  ;;  %v3131_v30 = vld [vmem:[%s4037_s1 + $0x210] sm:$0xff] }
  0x2d   :  { %1786 = vmatpush.bf16.msrb.mxu3 %v3126_v53  ;;  %v3140_v28 = vld [vmem:[%s4037_s1 + $0x258] sm:$0xff]  ;;  %v3147_v31 = vld [vmem:[%s4037_s1 + $0x290] sm:$0xff]  ;;  %v3130_v34 = vld [vmem:[%s4037_s1 + $0x208] sm:$0xff] }
  0x2e   :  { %1748 = vmatpush.bf16.msrb.mxu0 %v3101_v54  ;;  %v3156_v29 = vld [vmem:[%s4037_s1 + $0x2d8] sm:$0xff]  ;;  %v3139_v32 = vld [vmem:[%s4037_s1 + $0x250] sm:$0xff]  ;;  %v3146_v35 = vld [vmem:[%s4037_s1 + $0x288] sm:$0xff] }
  0x2f   :  { %1774 = vmatpush.bf16.msrb.mxu2 %v3117_v55  ;;  %v3155_v33 = vld [vmem:[%s4037_s1 + $0x2d0] sm:$0xff]  ;;  %v3138_v36 = vld [vmem:[%s4037_s1 + $0x248] sm:$0xff]  ;;  %v3129_v38 = vld [vmem:[%s4037_s1 + $0x200] sm:$0xff] }
  0x30   :  { %1761 = vmatpush.bf16.msrb.mxu1 %v3109_v56  ;;  %v3154_v37 = vld [vmem:[%s4037_s1 + $0x2c8] sm:$0xff]  ;;  %v3145_v39 = vld [vmem:[%s4037_s1 + $0x280] sm:$0xff]  ;;  %v3168_v40 = vld [vmem:[%s4037_s1 + $0x338] sm:$0xff] }
  0x31   :  { %1787 = vmatpush.bf16.msrb.mxu3 %v3125_v57  ;;  %v3184_v41 = vld [vmem:[%s4037_s1 + $0x3b8] sm:$0xff]  ;;  %v3137_v42 = vld [vmem:[%s4037_s1 + $0x240] sm:$0xff]  ;;  %v3167_v50 = vld [vmem:[%s4037_s1 + $0x330] sm:$0xff] }
  0x32   :  { %1749 = vmatpush.bf16.msrb.mxu0 %v3100_v58  ;;  %v3153_v43 = vld [vmem:[%s4037_s1 + $0x2c0] sm:$0xff]  ;;  %v3176_v44 = vld [vmem:[%s4037_s1 + $0x378] sm:$0xff]  ;;  %v3175_v52 = vld [vmem:[%s4037_s1 + $0x370] sm:$0xff] }
  0x33   :  { %1775 = vmatpush.bf16.msrb.mxu2 %v3116_v59  ;;  %v447_v45 = vld [vmem:[#allocation1] sm:$0xff]  ;;  %v449_v46 = vld [vmem:[#allocation1 + $0x12] sm:$0xff]  ;;  %v3166_v54 = vld [vmem:[%s4037_s1 + $0x328] sm:$0xff] }
  0x34   :  { %1762 = vmatpush.bf16.msrb.mxu1 %v3108_v60  ;;  %v3191_v53 = vld [vmem:[%s4037_s1 + $0x3f0] sm:$0xff]  ;;  %v3182_v55 = vld [vmem:[%s4037_s1 + $0x3a8] sm:$0xff]  ;;  %v3165_v58 = vld [vmem:[%s4037_s1 + $0x320] sm:$0xff] }
  0x35   :  { %1788 = vmatpush.bf16.msrb.mxu3 %v3124_v61  ;;  %v3174_v56 = vld [vmem:[%s4037_s1 + $0x368] sm:$0xff]  ;;  %v3181_v59 = vld [vmem:[%s4037_s1 + $0x3a0] sm:$0xff] }
  0x36   :  { %1750 = vmatpush.bf16.msrb.mxu0 %v3099_v62  ;;  %v3190_v57 = vld [vmem:[%s4037_s1 + $0x3e8] sm:$0xff]  ;;  %v3173_v60 = vld [vmem:[%s4037_s1 + $0x360] sm:$0xff]  ;;  %v3164_v62 = vld [vmem:[%s4037_s1 + $0x318] sm:$0xff] }
  0x37   :  { %1776 = vmatpush.bf16.msrb.mxu2 %v3115_v63  ;;  %v3189_v61 = vld [vmem:[%s4037_s1 + $0x3e0] sm:$0xff]  ;;  %v3180_v63 = vld [vmem:[%s4037_s1 + $0x398] sm:$0xff] }
  0x38   :  { %1763 = vmatpush.bf16.msrb.mxu1 %v3107_v0  ;;  %v3172_v0 = vld [vmem:[%s4037_s1 + $0x358] sm:$0xff] }
  0x39   :  { %1789 = vmatpush.bf16.msrb.mxu3 %v3123_v1  ;;  %v3188_v1 = vld [vmem:[%s4037_s1 + $0x3d8] sm:$0xff] }
  0x3a   :  { %1751 = vmatpush.bf16.msrb.mxu0 %v3098_v2  ;;  %v3163_v2 = vld [vmem:[%s4037_s1 + $0x310] sm:$0xff] }
  0x3b   :  { %1777 = vmatpush.bf16.msrb.mxu2 %v3114_v3  ;;  %v3179_v3 = vld [vmem:[%s4037_s1 + $0x390] sm:$0xff] }
  0x3c   :  { %1764 = vmatpush.bf16.msrb.mxu1 %v3106_v4  ;;  %v3171_v4 = vld [vmem:[%s4037_s1 + $0x350] sm:$0xff] }
  0x3d   :  { %1790 = vmatpush.bf16.msrb.mxu3 %v3122_v5  ;;  %v3187_v5 = vld [vmem:[%s4037_s1 + $0x3d0] sm:$0xff] }
  0x3e   :  { %1752 = vmatpush.bf16.msrb.mxu0 %v3097_v6  ;;  %v3162_v6 = vld [vmem:[%s4037_s1 + $0x308] sm:$0xff] }
  0x3f   :  { %1778 = vmatpush.bf16.msrb.mxu2 %v3113_v7  ;;  %v3178_v7 = vld [vmem:[%s4037_s1 + $0x388] sm:$0xff] }
  0x40   :  { %1765 = vmatpush.bf16.msrb.mxu1 %v3105_v10  ;;  %v452_v10 = vld [vmem:[#allocation1 + $0x2d] sm:$0xff] }
  0x41   :  { %1791 = vmatpush.bf16.msrb.mxu3 %v3121_v11  ;;  %1753 = vmatmul.bf16.vlgmr.msrb.gmra.mxu0 %v3483_v48  ;;  %v448_v48 = vld [vmem:[#allocation1 + $0x9] sm:$0xff]  ;;  %v454_v11 = vld [vmem:[#allocation1 + $0x3f] sm:$0xff] }
  0x42   :  { %1797 = vmatpush.bf16.msra.mxu0 %v3136_v8  ;;  %1779 = vmatmul.bf16.vlgmr.msrb.gmra.mxu2 %v3481_v47  ;;  %v3192_v47 = vld [vmem:[%s4037_s1 + $0x3f8] sm:$0xff]  ;;  %v451_v8 = vld [vmem:[#allocation1 + $0x24] sm:$0xff] }
  0x43   :  { %1823 = vmatpush.bf16.msra.mxu2 %v3152_v9  ;;  %1766 = vmatmul.bf16.vlgmr.msrb.gmra.mxu1 %v3490_v51  ;;  %v3183_v51 = vld [vmem:[%s4037_s1 + $0x3b0] sm:$0xff] }
  0x44   :  { %1810 = vmatpush.bf16.msra.mxu1 %v3144_v12  ;;  %1792 = vmatmul.bf16.vlgmr.msrb.gmra.mxu3 %v3485_v49  ;;  %v450_v49 = vld [vmem:[#allocation1 + $0x1b] sm:$0xff]  ;;  %v29_v12 = vld [vmem:[%s4036_s0 + $0x10] sm:$0xff] }
  0x45   :  { %1836 = vmatpush.bf16.msra.mxu3 %v3160_v13  ;;  %v453_v9 = vld [vmem:[#allocation1 + $0x36] sm:$0xff]  ;;  %v3170_v13 = vld [vmem:[%s4037_s1 + $0x348] sm:$0xff] }
  0x46   :  { %1798 = vmatpush.bf16.msra.mxu0 %v3135_v14  ;;  %456 = vst [vmem:[#allocation1] ss:$9 sm:$0xff] %v29_v12  ;;  %v3186_v14 = vld [vmem:[%s4037_s1 + $0x3c8] sm:$0xff]  ;;  %v3244_v12 = vld [vmem:[%s4037_s1 + $0x598] sm:$0xff] }
  0x47   :  { %1824 = vmatpush.bf16.msra.mxu2 %v3151_v15  ;;  %v3161_v15 = vld [vmem:[%s4037_s1 + $0x300] sm:$0xff] }
  0x48   :  { %1811 = vmatpush.bf16.msra.mxu1 %v3143_v16  ;;  %v3177_v16 = vld [vmem:[%s4037_s1 + $0x380] sm:$0xff] }
  0x49   :  { %1837 = vmatpush.bf16.msra.mxu3 %v3159_v17  ;;  %v3200_v17 = vld [vmem:[%s4037_s1 + $0x438] sm:$0xff] }
  0x4a   :  { %1799 = vmatpush.bf16.msra.mxu0 %v3134_v18  ;;  %v3216_v18 = vld [vmem:[%s4037_s1 + $0x4b8] sm:$0xff] }
  0x4b   :  { %1825 = vmatpush.bf16.msra.mxu2 %v3150_v19  ;;  %v3169_v19 = vld [vmem:[%s4037_s1 + $0x340] sm:$0xff] }
  0x4c   :  { %1812 = vmatpush.bf16.msra.mxu1 %v3142_v20  ;;  %v3185_v20 = vld [vmem:[%s4037_s1 + $0x3c0] sm:$0xff] }
  0x4d   :  { %1838 = vmatpush.bf16.msra.mxu3 %v3158_v21  ;;  %v3208_v21 = vld [vmem:[%s4037_s1 + $0x478] sm:$0xff] }
  0x4e   :  { %1800 = vmatpush.bf16.msra.mxu0 %v3133_v22  ;;  %v3224_v22 = vld [vmem:[%s4037_s1 + $0x4f8] sm:$0xff] }
  0x4f   :  { %1826 = vmatpush.bf16.msra.mxu2 %v3149_v23  ;;  %v3199_v23 = vld [vmem:[%s4037_s1 + $0x430] sm:$0xff] }
  0x50   :  { %1813 = vmatpush.bf16.msra.mxu1 %v3141_v24  ;;  %v3215_v24 = vld [vmem:[%s4037_s1 + $0x4b0] sm:$0xff] }
  0x51   :  { %1839 = vmatpush.bf16.msra.mxu3 %v3157_v25  ;;  %v3207_v25 = vld [vmem:[%s4037_s1 + $0x470] sm:$0xff] }
  0x52   :  { %1801 = vmatpush.bf16.msra.mxu0 %v3132_v26  ;;  %v3223_v26 = vld [vmem:[%s4037_s1 + $0x4f0] sm:$0xff] }
  0x53   :  { %1827 = vmatpush.bf16.msra.mxu2 %v3148_v27  ;;  %v3198_v27 = vld [vmem:[%s4037_s1 + $0x428] sm:$0xff] }
  0x54   :  { %1814 = vmatpush.bf16.msra.mxu1 %v3140_v28  ;;  %v3214_v28 = vld [vmem:[%s4037_s1 + $0x4a8] sm:$0xff] }
  0x55   :  { %1840 = vmatpush.bf16.msra.mxu3 %v3156_v29  ;;  %v3206_v29 = vld [vmem:[%s4037_s1 + $0x468] sm:$0xff] }
  0x56   :  { %1802 = vmatpush.bf16.msra.mxu0 %v3131_v30  ;;  %v3222_v30 = vld [vmem:[%s4037_s1 + $0x4e8] sm:$0xff] }
  0x57   :  { %1828 = vmatpush.bf16.msra.mxu2 %v3147_v31  ;;  %v3197_v31 = vld [vmem:[%s4037_s1 + $0x420] sm:$0xff] }
  0x58   :  { %1815 = vmatpush.bf16.msra.mxu1 %v3139_v32  ;;  %v3213_v32 = vld [vmem:[%s4037_s1 + $0x4a0] sm:$0xff] }
  0x59   :  { %1841 = vmatpush.bf16.msra.mxu3 %v3155_v33  ;;  %v3205_v33 = vld [vmem:[%s4037_s1 + $0x460] sm:$0xff] }
  0x5a   :  { %1803 = vmatpush.bf16.msra.mxu0 %v3130_v34  ;;  %v3221_v34 = vld [vmem:[%s4037_s1 + $0x4e0] sm:$0xff] }
  0x5b   :  { %1829 = vmatpush.bf16.msra.mxu2 %v3146_v35  ;;  %v3196_v35 = vld [vmem:[%s4037_s1 + $0x418] sm:$0xff] }
  0x5c   :  { %1816 = vmatpush.bf16.msra.mxu1 %v3138_v36  ;;  %v3212_v36 = vld [vmem:[%s4037_s1 + $0x498] sm:$0xff] }
  0x5d   :  { %1842 = vmatpush.bf16.msra.mxu3 %v3154_v37  ;;  %v3204_v37 = vld [vmem:[%s4037_s1 + $0x458] sm:$0xff] }
  0x5e   :  { %1804 = vmatpush.bf16.msra.mxu0 %v3129_v38  ;;  %v3220_v38 = vld [vmem:[%s4037_s1 + $0x4d8] sm:$0xff] }
  0x5f   :  { %1830 = vmatpush.bf16.msra.mxu2 %v3145_v39  ;;  %v3195_v39 = vld [vmem:[%s4037_s1 + $0x410] sm:$0xff] }
  0x60   :  { %1817 = vmatpush.bf16.msra.mxu1 %v3137_v42  ;;  %v3219_v42 = vld [vmem:[%s4037_s1 + $0x4d0] sm:$0xff] }
  0x61   :  { %1843 = vmatpush.bf16.msra.mxu3 %v3153_v43  ;;  %1805 = vmatmul.bf16.vlgmr.msra.gmra.mxu0 %v447_v45  ;;  %v3194_v43 = vld [vmem:[%s4037_s1 + $0x408] sm:$0xff] }
  0x62   :  { %1849 = vmatpush.bf16.msrb.mxu0 %v3168_v40  ;;  %1831 = vmatmul.bf16.vlgmr.msra.gmra.mxu2 %v449_v46  ;;  %v3211_v40 = vld [vmem:[%s4037_s1 + $0x490] sm:$0xff]  ;;  %v3202_v45 = vld [vmem:[%s4037_s1 + $0x448] sm:$0xff] }
  0x63   :  { %1875 = vmatpush.bf16.msrb.mxu2 %v3184_v41  ;;  %1818 = vmatmul.bf16.vlgmr.msra.gmra.mxu1 %v448_v48  ;;  %v3203_v41 = vld [vmem:[%s4037_s1 + $0x450] sm:$0xff]  ;;  %v3218_v46 = vld [vmem:[%s4037_s1 + $0x4c8] sm:$0xff]  ;;  %v3209_v48 = vld [vmem:[%s4037_s1 + $0x480] sm:$0xff] }
  0x64   :  { %1862 = vmatpush.bf16.msrb.mxu1 %v3176_v44  ;;  %1844 = vmatmul.bf16.vlgmr.msra.gmra.mxu3 %v450_v49  ;;  %v3210_v44 = vld [vmem:[%s4037_s1 + $0x488] sm:$0xff]  ;;  %v3232_v49 = vld [vmem:[%s4037_s1 + $0x538] sm:$0xff] }
  0x65   :  { %1888 = vmatpush.bf16.msrb.mxu3 %v3192_v47  ;;  %v3193_v47 = vld [vmem:[%s4037_s1 + $0x400] sm:$0xff] }
  0x66   :  { %1850 = vmatpush.bf16.msrb.mxu0 %v3167_v50  ;;  %v3248_v50 = vld [vmem:[%s4037_s1 + $0x5b8] sm:$0xff] }
  0x67   :  { %1876 = vmatpush.bf16.msrb.mxu2 %v3183_v51  ;;  %v3201_v51 = vld [vmem:[%s4037_s1 + $0x440] sm:$0xff] }
  0x68   :  { %1863 = vmatpush.bf16.msrb.mxu1 %v3175_v52  ;;  %v3217_v52 = vld [vmem:[%s4037_s1 + $0x4c0] sm:$0xff] }
  0x69   :  { %1889 = vmatpush.bf16.msrb.mxu3 %v3191_v53  ;;  %v3240_v53 = vld [vmem:[%s4037_s1 + $0x578] sm:$0xff] }
  0x6a   :  { %1851 = vmatpush.bf16.msrb.mxu0 %v3166_v54  ;;  %v457_v54 = vld [vmem:[#allocation1] sm:$0xff] }
  0x6b   :  { %1877 = vmatpush.bf16.msrb.mxu2 %v3182_v55  ;;  %v459_v55 = vld [vmem:[#allocation1 + $0x12] sm:$0xff] }
  0x6c   :  { %1864 = vmatpush.bf16.msrb.mxu1 %v3174_v56  ;;  %v3256_v56 = vld [vmem:[%s4037_s1 + $0x5f8] sm:$0xff] }
  0x6d   :  { %1890 = vmatpush.bf16.msrb.mxu3 %v3190_v57  ;;  %v458_v57 = vld [vmem:[#allocation1 + $0x9] sm:$0xff] }
  0x6e   :  { %1852 = vmatpush.bf16.msrb.mxu0 %v3165_v58  ;;  %v460_v58 = vld [vmem:[#allocation1 + $0x1b] sm:$0xff] }
  0x6f   :  { %1878 = vmatpush.bf16.msrb.mxu2 %v3181_v59  ;;  %v3231_v59 = vld [vmem:[%s4037_s1 + $0x530] sm:$0xff] }
  0x70   :  { %1865 = vmatpush.bf16.msrb.mxu1 %v3173_v60  ;;  %v3247_v60 = vld [vmem:[%s4037_s1 + $0x5b0] sm:$0xff] }
  0x71   :  { %1891 = vmatpush.bf16.msrb.mxu3 %v3189_v61  ;;  %v3239_v61 = vld [vmem:[%s4037_s1 + $0x570] sm:$0xff] }
  0x72   :  { %1853 = vmatpush.bf16.msrb.mxu0 %v3164_v62  ;;  %v3255_v62 = vld [vmem:[%s4037_s1 + $0x5f0] sm:$0xff] }
  0x73   :  { %1879 = vmatpush.bf16.msrb.mxu2 %v3180_v63  ;;  %v3230_v63 = vld [vmem:[%s4037_s1 + $0x528] sm:$0xff] }
  0x74   :  { %1866 = vmatpush.bf16.msrb.mxu1 %v3172_v0  ;;  %v3246_v0 = vld [vmem:[%s4037_s1 + $0x5a8] sm:$0xff] }
  0x75   :  { %1892 = vmatpush.bf16.msrb.mxu3 %v3188_v1  ;;  %v3238_v1 = vld [vmem:[%s4037_s1 + $0x568] sm:$0xff] }
  0x76   :  { %1854 = vmatpush.bf16.msrb.mxu0 %v3163_v2  ;;  %v3254_v2 = vld [vmem:[%s4037_s1 + $0x5e8] sm:$0xff] }
  0x77   :  { %1880 = vmatpush.bf16.msrb.mxu2 %v3179_v3  ;;  %v3282_v3 = vld [vmem:[%s4038_s2] ss:$0 sm:$0xff] }
  0x78   :  { %1867 = vmatpush.bf16.msrb.mxu1 %v3171_v4  ;;  %v3229_v4 = vld [vmem:[%s4037_s1 + $0x520] sm:$0xff] }
  0x79   :  { %1893 = vmatpush.bf16.msrb.mxu3 %v3187_v5  ;;  %v3245_v5 = vld [vmem:[%s4037_s1 + $0x5a0] sm:$0xff] }
  0x7a   :  { %1855 = vmatpush.bf16.msrb.mxu0 %v3162_v6 }
  0x7b   :  { %1881 = vmatpush.bf16.msrb.mxu2 %v3178_v7  ;;  %v3237_v7 = vld [vmem:[%s4037_s1 + $0x560] sm:$0xff] }
  0x7c   :  { %1868 = vmatpush.bf16.msrb.mxu1 %v3170_v13 }
  0x7d   :  { %1894 = vmatpush.bf16.msrb.mxu3 %v3186_v14  ;;  %v3236_v14 = vld [vmem:[%s4037_s1 + $0x558] sm:$0xff] }
  0x7e   :  { %1856 = vmatpush.bf16.msrb.mxu0 %v3161_v15  ;;  %v3252_v15 = vld [vmem:[%s4037_s1 + $0x5d8] sm:$0xff] }
  0x7f   :  { %1882 = vmatpush.bf16.msrb.mxu2 %v3177_v16 }
  0x80   :  { %1869 = vmatpush.bf16.msrb.mxu1 %v3169_v19 }
  0x81   :  { %1895 = vmatpush.bf16.msrb.mxu3 %v3185_v20  ;;  %1857 = vmatmul.bf16.vlgmr.msrb.gmra.mxu0 %v451_v8  ;;  %v3253_v8 = vld [vmem:[%s4037_s1 + $0x5e0] sm:$0xff] }
  0x82   :  { %1901 = vmatpush.bf16.msra.mxu0 %v3200_v17  ;;  %1883 = vmatmul.bf16.vlgmr.msrb.gmra.mxu2 %v453_v9  ;;  %v3227_v17 = vld [vmem:[%s4037_s1 + $0x510] sm:$0xff] }
  0x83   :  { %1927 = vmatpush.bf16.msra.mxu2 %v3216_v18  ;;  %1870 = vmatmul.bf16.vlgmr.msrb.gmra.mxu1 %v452_v10  ;;  %v3243_v18 = vld [vmem:[%s4037_s1 + $0x590] sm:$0xff] }
  0x84   :  { %1914 = vmatpush.bf16.msra.mxu1 %v3208_v21  ;;  %1896 = vmatmul.bf16.vlgmr.msrb.gmra.mxu3 %v454_v11  ;;  %v3228_v11 = vld [vmem:[%s4037_s1 + $0x518] sm:$0xff] }
  0x85   :  { %1940 = vmatpush.bf16.msra.mxu3 %v3224_v22  ;;  %v3235_v22 = vld [vmem:[%s4037_s1 + $0x550] sm:$0xff] }
  0x86   :  { %1902 = vmatpush.bf16.msra.mxu0 %v3199_v23  ;;  %v3251_v23 = vld [vmem:[%s4037_s1 + $0x5d0] sm:$0xff] }
  0x87   :  { %1928 = vmatpush.bf16.msra.mxu2 %v3215_v24  ;;  %v3226_v24 = vld [vmem:[%s4037_s1 + $0x508] sm:$0xff] }
  0x88   :  { %1915 = vmatpush.bf16.msra.mxu1 %v3207_v25 }
  0x89   :  { %1941 = vmatpush.bf16.msra.mxu3 %v3223_v26  ;;  %v3242_v26 = vld [vmem:[%s4037_s1 + $0x588] sm:$0xff] }
  0x8a   :  { %1903 = vmatpush.bf16.msra.mxu0 %v3198_v27  ;;  %v461_v27 = vld [vmem:[#allocation1 + $0x24] sm:$0xff] }
  0x8b   :  { %1929 = vmatpush.bf16.msra.mxu2 %v3214_v28  ;;  %v463_v28 = vld [vmem:[#allocation1 + $0x36] sm:$0xff] }
  0x8c   :  { %1916 = vmatpush.bf16.msra.mxu1 %v3206_v29 }
  0x8d   :  { %1942 = vmatpush.bf16.msra.mxu3 %v3222_v30  ;;  %v462_v30 = vld [vmem:[#allocation1 + $0x2d] sm:$0xff] }
  0x8e   :  { %1904 = vmatpush.bf16.msra.mxu0 %v3197_v31  ;;  %v464_v31 = vld [vmem:[#allocation1 + $0x3f] sm:$0xff] }
  0x8f   :  { %1930 = vmatpush.bf16.msra.mxu2 %v3213_v32  ;;  %v30_v32 = vld [vmem:[%s4036_s0 + $0x18] sm:$0x1] }
  0x90   :  { %1917 = vmatpush.bf16.msra.mxu1 %v3205_v33  ;;  %466 = vst [vmem:[#allocation1] ss:$9 sm:$0xff] %v30_v32  ;;  %v3234_v33 = vld [vmem:[%s4037_s1 + $0x548] sm:$0xff] }
  0x91   :  { %1943 = vmatpush.bf16.msra.mxu3 %v3221_v34  ;;  %v3250_v34 = vld [vmem:[%s4037_s1 + $0x5c8] sm:$0xff] }
  0x92   :  { %1905 = vmatpush.bf16.msra.mxu0 %v3196_v35 }
  0x93   :  { %1931 = vmatpush.bf16.msra.mxu2 %v3212_v36  ;;  %v3225_v36 = vld [vmem:[%s4037_s1 + $0x500] sm:$0xff] }
  0x94   :  { %1918 = vmatpush.bf16.msra.mxu1 %v3204_v37  ;;  %v3241_v37 = vld [vmem:[%s4037_s1 + $0x580] sm:$0xff] }
  0x95   :  { %1944 = vmatpush.bf16.msra.mxu3 %v3220_v38  ;;  %v3264_v38 = vld [vmem:[%s4037_s1 + $0x638] sm:$0xff] }
  0x96   :  { %1906 = vmatpush.bf16.msra.mxu0 %v3195_v39 }
  0x97   :  { %1932 = vmatpush.bf16.msra.mxu2 %v3211_v40  ;;  %v3233_v40 = vld [vmem:[%s4037_s1 + $0x540] sm:$0xff] }
  0x98   :  { %1919 = vmatpush.bf16.msra.mxu1 %v3203_v41  ;;  %v3249_v41 = vld [vmem:[%s4037_s1 + $0x5c0] sm:$0xff] }
  0x99   :  { %1945 = vmatpush.bf16.msra.mxu3 %v3219_v42  ;;  %v3263_v42 = vld [vmem:[%s4037_s1 + $0x630] sm:$0xff] }
  0x9a   :  { %1907 = vmatpush.bf16.msra.mxu0 %v3194_v43  ;;  %v3262_v43 = vld [vmem:[%s4037_s1 + $0x628] sm:$0xff] }
  0x9b   :  { %1933 = vmatpush.bf16.msra.mxu2 %v3210_v44  ;;  %v3261_v44 = vld [vmem:[%s4037_s1 + $0x620] sm:$0xff] }
  0x9c   :  { %1920 = vmatpush.bf16.msra.mxu1 %v3202_v45 }
  0x9d   :  { %1946 = vmatpush.bf16.msra.mxu3 %v3218_v46 }
  0x9e   :  { %1908 = vmatpush.bf16.msra.mxu0 %v3193_v47  ;;  %v1702_v6 = vpop.f32.mrf.mxu0 }
  0x9f   :  { %1934 = vmatpush.bf16.msra.mxu2 %v3209_v48  ;;  %v1703_v9 = vadd.f32 %v3282_v3, %v1702_v6 }
  0xa0   :  { %1921 = vmatpush.bf16.msra.mxu1 %v3201_v51  ;;  %v1715_v10 = vpop.f32.mrf.mxu1 }
  0xa1   :  { %1947 = vmatpush.bf16.msra.mxu3 %v3217_v52  ;;  %1909 = vmatmul.bf16.vlgmr.msra.gmra.mxu0 %v457_v54  ;;  %v1716_v13 = vadd.f32 %v1715_v10, %v1703_v9  ;;  %v3259_v52 = vld [vmem:[%s4037_s1 + $0x610] sm:$0xff] }
  0xa2   :  { %1953 = vmatpush.bf16.msrb.mxu0 %v3232_v49  ;;  %1935 = vmatmul.bf16.vlgmr.msra.gmra.mxu2 %v459_v55  ;;  %v3260_v49 = vld [vmem:[%s4037_s1 + $0x618] sm:$0xff] }
  0xa3   :  { %1979 = vmatpush.bf16.msrb.mxu2 %v3248_v50  ;;  %1922 = vmatmul.bf16.vlgmr.msra.gmra.mxu1 %v458_v57  ;;  %v3258_v57 = vld [vmem:[%s4037_s1 + $0x608] sm:$0xff] }
  0xa4   :  { %1966 = vmatpush.bf16.msrb.mxu1 %v3240_v53  ;;  %1948 = vmatmul.bf16.vlgmr.msra.gmra.mxu3 %v460_v58 }
  0xa5   :  { %1992 = vmatpush.bf16.msrb.mxu3 %v3256_v56  ;;  %v1728_v16 = vpop.f32.mrf.mxu2 }
  0xa6   :  { %1954 = vmatpush.bf16.msrb.mxu0 %v3231_v59  ;;  %v1729_v19 = vadd.f32 %v1728_v16, %v1716_v13  ;;  %v1704_v21 = vpop.f32.mrf.mxu0  ;;  %v3257_v59 = vld [vmem:[%s4037_s1 + $0x600] sm:$0xff] }
  0xa7   :  { %1980 = vmatpush.bf16.msrb.mxu2 %v3247_v60  ;;  %v1741_v20 = vpop.f32.mrf.mxu3 }
  0xa8   :  { %1967 = vmatpush.bf16.msrb.mxu1 %v3239_v61  ;;  %v1742_v25 = vadd.f32 %v1741_v20, %v1729_v19  ;;  %v1717_v29 = vpop.f32.mrf.mxu1  ;;  %v467_v61 = vld [vmem:[#allocation1] sm:$0xff] }
  0xa9   :  { %1993 = vmatpush.bf16.msrb.mxu3 %v3255_v62  ;;  %v3270_v29 = vld [vmem:[%s4039_s3 + $0x28] sm:$0xff] }
  0xaa   :  { %1955 = vmatpush.bf16.msrb.mxu0 %v3230_v63 }
  0xab   :  { %1981 = vmatpush.bf16.msrb.mxu2 %v3246_v0 }
  0xac   :  { %1968 = vmatpush.bf16.msrb.mxu1 %v3238_v1 }
  0xad   :  { %1994 = vmatpush.bf16.msrb.mxu3 %v3254_v2  ;;  %v1730_v35 = vpop.f32.mrf.mxu2 }
  0xae   :  { %1956 = vmatpush.bf16.msrb.mxu0 %v3229_v4  ;;  %v3267_v35 = vld [vmem:[%s4039_s3 + $0x10] sm:$0xff] }
  0xaf   :  { %1982 = vmatpush.bf16.msrb.mxu2 %v3245_v5  ;;  %v1743_v39 = vpop.f32.mrf.mxu3 }
  0xb0   :  { %1969 = vmatpush.bf16.msrb.mxu1 %v3237_v7 }
  0xb1   :  { %1995 = vmatpush.bf16.msrb.mxu3 %v3253_v8 }
  0xb2   :  { %1957 = vmatpush.bf16.msrb.mxu0 %v3228_v11 }
  0xb3   :  { %1983 = vmatpush.bf16.msrb.mxu2 %v3244_v12 }
  0xb4   :  { %1970 = vmatpush.bf16.msrb.mxu1 %v3236_v14 }
  0xb5   :  { %1996 = vmatpush.bf16.msrb.mxu3 %v3252_v15 }
  0xb6   :  { %1958 = vmatpush.bf16.msrb.mxu0 %v3227_v17 }
  0xb7   :  { %1984 = vmatpush.bf16.msrb.mxu2 %v3243_v18 }
  0xb8   :  { %1971 = vmatpush.bf16.msrb.mxu1 %v3235_v22 }
  0xb9   :  { %1997 = vmatpush.bf16.msrb.mxu3 %v3251_v23  ;;  %v3272_v23 = vld [vmem:[%s4039_s3 + $0x38] sm:$0xff] }
  0xba   :  { %1959 = vmatpush.bf16.msrb.mxu0 %v3226_v24 }
  0xbb   :  { %1985 = vmatpush.bf16.msrb.mxu2 %v3242_v26  ;;  %v3271_v26 = vld [vmem:[%s4039_s3 + $0x30] sm:$0xff] }
  0xbc   :  { %1972 = vmatpush.bf16.msrb.mxu1 %v3234_v33 }
  0xbd   :  { %1998 = vmatpush.bf16.msrb.mxu3 %v3250_v34  ;;  %v3268_v34 = vld [vmem:[%s4039_s3 + $0x18] sm:$0xff] }
  0xbe   :  { %1960 = vmatpush.bf16.msrb.mxu0 %v3225_v36  ;;  %v1754_v45 = vpop.f32.mrf.mxu0  ;;  %v3266_v36 = vld [vmem:[%s4039_s3 + $0x8] sm:$0xff] }
  0xbf   :  { %1986 = vmatpush.bf16.msrb.mxu2 %v3241_v37  ;;  %v1755_v46 = vadd.f32 %v1754_v45, %v1742_v25  ;;  %v3279_v45 = vld [vmem:[%s4041_s5 + $0x30] sm:$0xff] }
  0xc0   :  { %1973 = vmatpush.bf16.msrb.mxu1 %v3233_v40  ;;  %v1767_v47 = vpop.f32.mrf.mxu1 }
  0xc1   :  { %1999 = vmatpush.bf16.msrb.mxu3 %v3249_v41  ;;  %1961 = vmatmul.bf16.vlgmr.msrb.gmra.mxu0 %v461_v27  ;;  %v1768_v48 = vadd.f32 %v1767_v47, %v1755_v46  ;;  %v3280_v41 = vld [vmem:[%s4041_s5 + $0x38] sm:$0xff] }
  0xc2   :  { %2005 = vmatpush.bf16.msra.mxu0 %v3264_v38  ;;  %1987 = vmatmul.bf16.vlgmr.msrb.gmra.mxu2 %v463_v28  ;;  %v3265_v38 = vld [vmem:[%s4039_s3] sm:$0xff] }
  0xc3   :  { %1974 = vmatmul.bf16.vlgmr.msrb.gmra.mxu1 %v462_v30  ;;  %2171 = vmatpush.bf16.msra.mxu2 %v3280_v41 }
  0xc4   :  { %2000 = vmatmul.bf16.vlgmr.msrb.gmra.mxu3 %v464_v31  ;;  %2088 = vmatpush.bf16.msra.mxu1 %v3272_v23  ;;  %v3269_v31 = vld [vmem:[%s4039_s3 + $0x20] sm:$0xff] }
  0xc5   :  { %v1780_v50 = vpop.f32.mrf.mxu2 }
  0xc6   :  { %2006 = vmatpush.bf16.msra.mxu0 %v3263_v42  ;;  %v1781_v51 = vadd.f32 %v1780_v50, %v1768_v48  ;;  %v1756_v54 = vpop.f32.mrf.mxu0  ;;  %v3278_v48 = vld [vmem:[%s4041_s5 + $0x28] sm:$0xff] }
  0xc7   :  { %v1793_v53 = vpop.f32.mrf.mxu3  ;;  %2172 = vmatpush.bf16.msra.mxu2 %v3279_v45 }
  0xc8   :  { %v1794_v55 = vadd.f32 %v1793_v53, %v1781_v51  ;;  %v1769_v56 = vpop.f32.mrf.mxu1  ;;  %2089 = vmatpush.bf16.msra.mxu1 %v3271_v26 }
  0xca   :  { %2007 = vmatpush.bf16.msra.mxu0 %v3262_v43 }
  0xcb   :  { %2173 = vmatpush.bf16.msra.mxu2 %v3278_v48 }
  0xcc   :  { %2090 = vmatpush.bf16.msra.mxu1 %v3270_v29 }
  0xcd   :  { %v1782_v58 = vpop.f32.mrf.mxu2 }
  0xce   :  { %2008 = vmatpush.bf16.msra.mxu0 %v3261_v44 }
  0xcf   :  { %v1795_v60 = vpop.f32.mrf.mxu3 }
  0xd0   :  { %2091 = vmatpush.bf16.msra.mxu1 %v3269_v31 }
  0xd2   :  { %2009 = vmatpush.bf16.msra.mxu0 %v3260_v49 }
  0xd4   :  { %2092 = vmatpush.bf16.msra.mxu1 %v3268_v34 }
  0xd6   :  { %2010 = vmatpush.bf16.msra.mxu0 %v3259_v52  ;;  %v3277_v52 = vld [vmem:[%s4041_s5 + $0x20] sm:$0xff] }
  0xd7   :  { %2174 = vmatpush.bf16.msra.mxu2 %v3277_v52 }
  0xd8   :  { %2093 = vmatpush.bf16.msra.mxu1 %v3267_v35 }
  0xda   :  { %2011 = vmatpush.bf16.msra.mxu0 %v3258_v57  ;;  %v3275_v57 = vld [vmem:[%s4041_s5 + $0x10] sm:$0xff] }
  0xdc   :  { %2094 = vmatpush.bf16.msra.mxu1 %v3266_v36 }
  0xde   :  { %2012 = vmatpush.bf16.msra.mxu0 %v3257_v59  ;;  %v1806_v62 = vpop.f32.mrf.mxu0 }
  0xdf   :  { %v1807_v63 = vadd.f32 %v1806_v62, %v1794_v55  ;;  %v3276_v55 = vld [vmem:[%s4041_s5 + $0x18] sm:$0xff] }
  0xe0   :  { %v1819_v0 = vpop.f32.mrf.mxu1  ;;  %2095 = vmatpush.bf16.msra.mxu1 %v3265_v38  ;;  %2175 = vmatpush.bf16.msra.mxu2 %v3276_v55 }
  0xe1   :  { %2013 = vmatmul.bf16.vlgmr.msra.gmra.mxu0 %v467_v61  ;;  %v1820_v1 = vadd.f32 %v1819_v0, %v1807_v63 }
  0xe4   :  { %2176 = vmatpush.bf16.msra.mxu2 %v3275_v57 }
  0xe5   :  { %v1832_v2 = vpop.f32.mrf.mxu2 }
  0xe6   :  { %v1833_v3 = vadd.f32 %v1832_v2, %v1820_v1  ;;  %v1808_v5 = vpop.f32.mrf.mxu0  ;;  %v3274_v1 = vld [vmem:[%s4041_s5 + $0x8] sm:$0xff]  ;;  %v3273_v2 = vld [vmem:[%s4041_s5] sm:$0xff]  ;;  %s2192_s5 = sshll.u32 %s4043_s7, 4  ;;  %s2193_s5 = int_to_ptr.hbm [resolvable:$true] %s2192_s5 }
  0xe7   :  { %v1845_v4 = vpop.f32.mrf.mxu3 }
  0xe8   :  { %v1846_v6 = vadd.f32 %v1845_v4, %v1833_v3  ;;  %v1821_v7 = vpop.f32.mrf.mxu1  ;;  %2177 = vmatpush.bf16.msra.mxu2 %v3274_v1  ;;  %v3283_v3 = vld [vmem:[%s4040_s4] ss:$0 sm:$0xff] }
  0xec   :  { %2178 = vmatpush.bf16.msra.mxu2 %v3273_v2 }
  0xed   :  { %v1834_v8 = vpop.f32.mrf.mxu2 }
  0xef   :  { %v1847_v9 = vpop.f32.mrf.mxu3 }
  0xf0   :  { %v3284_v9 = vld [vmem:[%s4042_s6] ss:$0 sm:$0xff] }
  0xfe   :  { %v1858_v10 = vpop.f32.mrf.mxu0 }
  0xff   :  { %v1859_v11 = vadd.f32 %v1858_v10, %v1846_v6 }
 0x100   :  { %v1871_v12 = vpop.f32.mrf.mxu1 }
 0x101   :  { %v1872_v13 = vadd.f32 %v1871_v12, %v1859_v11 }
 0x105   :  { %v1884_v14 = vpop.f32.mrf.mxu2 }
 0x106   :  { %v1885_v15 = vadd.f32 %v1884_v14, %v1872_v13  ;;  %v1860_v17 = vpop.f32.mrf.mxu0 }
 0x107   :  { %v1897_v16 = vpop.f32.mrf.mxu3 }
 0x108   :  { %v1898_v18 = vadd.f32 %v1897_v16, %v1885_v15  ;;  %v1873_v19 = vpop.f32.mrf.mxu1 }
 0x10d   :  { %v1886_v20 = vpop.f32.mrf.mxu2 }
 0x10f   :  { %v1899_v21 = vpop.f32.mrf.mxu3 }
 0x11e   :  { %v1910_v22 = vpop.f32.mrf.mxu0 }
 0x11f   :  { %v1911_v42 = vadd.f32 %v1910_v22, %v1898_v18 }
 0x120   :  { %v1923_v24 = vpop.f32.mrf.mxu1 }
 0x121   :  { %v1924_v47 = vadd.f32 %v1923_v24, %v1911_v42 }
 0x125   :  { %v1936_v25 = vpop.f32.mrf.mxu2 }
 0x126   :  { %v1912_v28 = vpop.f32.mrf.mxu0  ;;  %v1937_v49 = vadd.f32 %v1936_v25, %v1924_v47 }
 0x127   :  { %v1949_v27 = vpop.f32.mrf.mxu3 }
 0x128   :  { %v1925_v30 = vpop.f32.mrf.mxu1  ;;  %v1950_v53 = vadd.f32 %v1949_v27, %v1937_v49 }
 0x12d   :  { %v1938_v32 = vpop.f32.mrf.mxu2 }
 0x12f   :  { %v1951_v33 = vpop.f32.mrf.mxu3 }
 0x13e   :  { %v1962_v37 = vpop.f32.mrf.mxu0 }
 0x13f   :  { %v1963_v54 = vadd.f32 %v1962_v37, %v1950_v53 }
 0x140   :  { %v1975_v39 = vpop.f32.mrf.mxu1 }
 0x141   :  { %v1976_v56 = vadd.f32 %v1975_v39, %v1963_v54 }
 0x145   :  { %v1988_v40 = vpop.f32.mrf.mxu2 }
 0x146   :  { %v1964_v44 = vpop.f32.mrf.mxu0  ;;  %v1989_v58 = vadd.f32 %v1988_v40, %v1976_v56 }
 0x147   :  { %v2001_v43 = vpop.f32.mrf.mxu3 }
 0x148   :  { %v1977_v46 = vpop.f32.mrf.mxu1  ;;  %v2002_v59 = vadd.f32 %v2001_v43, %v1989_v58 }
 0x14d   :  { %v1990_v50 = vpop.f32.mrf.mxu2 }
 0x14f   :  { %v2003_v51 = vpop.f32.mrf.mxu3 }
 0x15e   :  { %v2014_v60 = vpop.f32.mrf.mxu0 }
 0x15f   :  { %v2015_v61 = vadd.f32 %v2014_v60, %v2002_v59 }
 0x161   :  { %v2018_v62 = vmax.f32 %v2015_v61, 0.0 }
 0x163   :  { %v2019_v63 = vpack.c.bf16 %v2018_v62, %v2018_v62 }
 0x165   :  { %2096 = vmatmul.bf16.vlgmr.msra.gmra.mxu1 %v2019_v63 }
 0x166   :  { %v2016_v0 = vpop.f32.mrf.mxu0 }
 0x1e2   :  { %v2097_v4 = vpop.f32.mrf.mxu1 }
 0x1e3   :  { %v2098_v5 = vadd.f32 %v3283_v3, %v2097_v4 }
 0x1e5   :  { %v2101_v6 = vmax.f32 %v2098_v5, 0.0 }
 0x1e7   :  { %v2102_v7 = vpack.c.bf16 %v2101_v6, %v2101_v6 }
 0x1e9   :  { %2179 = vmatmul.bf16.vlgmr.msra.gmra.mxu2 %v2102_v7 }
 0x1ea   :  { %v2099_v8 = vpop.f32.mrf.mxu1 }
 0x26c   :  { %v2180_v10 = vpop.f32.mrf.mxu2 }
 0x26d   :  { %v2181_v11 = vadd.f32 %v3284_v9, %v2180_v10 }
 0x26f   :  { %2184 = vst [vmem:[#allocation2] sm:$0x3] %v2181_v11 }
 0x270   :  { %2195 = dma.vmem_to_hbm [thread:$0]  %s2191_s24, 32, %s2193_s5, [#allocation3]  }
 0x274   :  { %v2182_v12 = vpop.f32.mrf.mxu2 }
 0x275   :  { %3309 = dma.done.wait [#allocation3], 32  }
 0x276   :  { %3310 = vsyncadd [#allocation3], 4294967264 }
 0x277   :  { %2200 = vsyncpa [#allocation3], 1 }

</bundles_post_ra>
